<compile_context>
chip_gen: v7x
topology: tpu7x:2x2x1
jax: 0.10.0
libtpu: 0.0.40
codegen_flags: <defaults>
</compile_context>

<pallas_src>
import math

import jax
import jax.numpy as jnp
from jax import lax
from jax.experimental import pallas as pl
from jax.experimental.pallas import tpu as pltpu


def _pair(x):
    return (x, x) if isinstance(x, int) else tuple(x)


def _round_up(x, m):
    return ((x + m - 1) // m) * m


# ----------------------------------------------------------------------------
# Fused im2col + GEMM kernel.
# One grid step (n, g, hb) computes the (TH, Wout, Coutp) output tile of image
# n, group g, output-row block hb.  The full padded input slab of (n, g) is a
# resident VMEM block (re-used across hb steps by the pipeline); the kh*kw
# taps are accumulated in-kernel with per-tap MXU dots (K = Cin_g each).
# ----------------------------------------------------------------------------
def _make_conv_kernel(*, kh, kw, sh, sw, dh, dw, th, wout, coutp, has_bias):
    nrows = (th - 1) * sh + 1           # contiguous input rows covering TH outputs

    def kernel(*refs):
        if has_bias:
            x_ref, w_ref, b_ref, o_ref = refs
        else:
            x_ref, w_ref, o_ref = refs
            b_ref = None

        hb = pl.program_id(2)
        h0 = pl.multiple_of(hb * (th * sh), th * sh)   # first input row of block

        # Initialize the (lane-dense) output tile: bias row or zeros.
        if has_bias:
            o_ref[...] = jnp.broadcast_to(
                b_ref[...].reshape(1, 1, coutp), (th, wout, coutp)
            ).astype(o_ref.dtype)
        else:
            o_ref[...] = jnp.zeros_like(o_ref)

        # Tap accumulation (static kh*kw loop -> fully unrolled, VMEM-only).
        for i in range(kh):
            xi = x_ref[pl.ds(h0 + i * dh, nrows), :, :]     # (nrows, Wp, Cg)
            if sh > 1:                                      # not hit for stride 1
                xi = lax.slice(xi, (0, 0, 0), xi.shape, (sh, 1, 1))
            for j in range(kw):
                if sw == 1:
                    xij = xi[:, j * dw:j * dw + wout, :]    # (th, wout, Cg)
                else:
                    xij = lax.slice(
                        xi, (0, j * dw, 0),
                        (th, j * dw + (wout - 1) * sw + 1, xi.shape[2]),
                        (1, sw, 1))
                lhs = xij.reshape(th * wout, -1)            # (M_tile, Cg)
                w_tap = w_ref[i * kw + j, :, :]             # (Cg, Coutp)
                o_ref[...] += jnp.dot(
                    lhs, w_tap, preferred_element_type=jnp.float32,
                ).reshape(th, wout, coutp)

    return kernel


def conv2d_pallas(x, weight, bias=None, stride=(1, 1), padding=(0, 0),
                  dilation=(1, 1), groups=1, out_layout="NCHW",
                  block_rows=512):
    """Forward of F.conv2d(x, weight, bias, stride, padding, dilation, groups).

    x: (N, Cin, H, W) NCHW; weight: (Cout, Cin//groups, kh, kw) OIHW.
    Returns NCHW (default, matching the PyTorch module) or NHWC.
    """
    sh, sw = _pair(stride)
    ph, pw = _pair(padding)
    dh, dw = _pair(dilation)
    N, Cin, H, W = x.shape
    Cout, Cin_g, kh, kw = weight.shape
    G = groups
    assert Cin == Cin_g * G and Cout % G == 0
    Cout_g = Cout // G
    Coutp = _round_up(Cout_g, 128)            # lane-dense GEMM-N / output stores

    Hp, Wp = H + 2 * ph, W + 2 * pw
    Hout = (Hp - dh * (kh - 1) - 1) // sh + 1
    Wout = (Wp - dw * (kw - 1) - 1) // sw + 1
    assert Hout > 0 and Wout > 0

    # M tile: ~block_rows output pixels per grid step.
    TH = max(1, min(Hout, block_rows // max(1, Wout)))
    n_hb = -(-Hout // TH)
    Hout_pad = n_hb * TH
    Hp_ext = max(Hp, (Hout_pad - 1) * sh + (kh - 1) * dh + 1)

    # NCHW -> grouped NHWC, zero-padded once (no kh*kw im2col blowup in HBM).
    xh = jnp.transpose(x, (0, 2, 3, 1)).astype(jnp.float32)
    xh = jnp.pad(xh, ((0, 0), (ph, ph + (Hp_ext - Hp)), (pw, pw), (0, 0)))
    xh = xh.reshape(N, Hp_ext, Wp, G, Cin_g)
    xh = jnp.transpose(xh, (3, 0, 1, 2, 4))            # (G, N, Hp_ext, Wp, Cg)

    # OIHW -> (G, kh*kw, Cin_g, Coutp) with zero-padded output channels.
    wm = weight.astype(jnp.float32).reshape(G, Cout_g, Cin_g, kh, kw)
    wm = jnp.transpose(wm, (0, 3, 4, 2, 1)).reshape(G, kh * kw, Cin_g, Cout_g)
    wm = jnp.pad(wm, ((0, 0), (0, 0), (0, 0), (0, Coutp - Cout_g)))

    has_bias = bias is not None
    ins = [xh, wm]
    in_specs = [
        pl.BlockSpec((None, None, Hp_ext, Wp, Cin_g),
                     lambda n, g, hb: (g, n, 0, 0, 0)),
        pl.BlockSpec((None, kh * kw, Cin_g, Coutp),
                     lambda n, g, hb: (g, 0, 0, 0)),
    ]
    if has_bias:
        bm = jnp.pad(bias.astype(jnp.float32).reshape(G, 1, Cout_g),
                     ((0, 0), (0, 0), (0, Coutp - Cout_g)))
        ins.append(bm)
        in_specs.append(pl.BlockSpec((None, 1, Coutp),
                                     lambda n, g, hb: (g, 0, 0)))

    out_spec = pl.BlockSpec((None, None, TH, Wout, Coutp),
                            lambda n, g, hb: (g, n, hb, 0, 0))

    kernel = _make_conv_kernel(kh=kh, kw=kw, sh=sh, sw=sw, dh=dh, dw=dw,
                               th=TH, wout=Wout, coutp=Coutp,
                               has_bias=has_bias)

    # Explicit VMEM budget (double-buffered blocks); clamp for v7x's 64 MiB.
    f32 = 4
    need = 2 * (Hp_ext * Wp * Cin_g + kh * kw * Cin_g * Coutp
                + TH * Wout * Coutp + (Coutp if has_bias else 0)) * f32
    vmem_limit = int(min(64 * 1024 * 1024,
                         max(32 * 1024 * 1024, 2 * need + (2 << 20))))

    out = pl.pallas_call(
        kernel,
        out_shape=jax.ShapeDtypeStruct((G, N, Hout_pad, Wout, Coutp),
                                       jnp.float32),
        grid_spec=pltpu.PrefetchScalarGridSpec(
            num_scalar_prefetch=0,
            grid=(N, G, n_hb),
            in_specs=in_specs,
            out_specs=out_spec,
        ),
        compiler_params=pltpu.CompilerParams(
            dimension_semantics=("parallel", "arbitrary", "arbitrary"),
            vmem_limit_bytes=vmem_limit,
        ),
    )(*ins)

    # (G, N, Hout_pad, Wout, Coutp) -> (N, Hout, Wout, Cout)
    out = out[:, :, :Hout, :, :Cout_g]
    out = jnp.transpose(out, (1, 2, 3, 0, 4)).reshape(N, Hout, Wout, Cout)
    out = out.astype(x.dtype)
    if out_layout == "NHWC":
        return out
    return jnp.transpose(out, (0, 3, 1, 2))


# ----------------------------------------------------------------------------
# Parameter init: reproduces reset_parameters (kaiming_uniform_, a=sqrt(5)),
# i.e. weight ~ U(-1/sqrt(fan_in), 1/sqrt(fan_in)); same bound for bias.
# ----------------------------------------------------------------------------
def init_conv_params(key, in_channels, out_channels, kernel_size,
                     groups=1, bias=False):
    kh, kw = _pair(kernel_size)
    fan_in = (in_channels // groups) * kh * kw
    bound = 1.0 / math.sqrt(fan_in)
    kw_key, kb_key = jax.random.split(key)
    weight = jax.random.uniform(
        kw_key, (out_channels, in_channels // groups, kh, kw),
        minval=-bound, maxval=bound, dtype=jnp.float32)
    b = (jax.random.uniform(kb_key, (out_channels,), minval=-bound,
                            maxval=bound, dtype=jnp.float32) if bias else None)
    return weight, b


# Quantized-mode weight generation (get_weight with quant_vals): forward
# semantics of straight_through_softmax (gumbel-softmax sample), kept in plain
# JAX since it is parameter generation, not the conv hot path.
# TODO(synk): GradientTransfer / straight-through custom backward passes are
# training-only autograd tricks with no forward-pass effect; not translated.
def quantized_weight(key, alpha, quant_vals, hard=False, temp=1.0, random=1.0):
    g = -jnp.log(jax.random.exponential(key, alpha.shape))      # Gumbel(0,1)
    y = jax.nn.softmax((alpha + g * random) / temp, axis=-1)
    if hard:
        y = jax.nn.one_hot(jnp.argmax(y, axis=-1), alpha.shape[-1],
                           dtype=alpha.dtype)
    return jnp.sum(y * quant_vals, axis=-1)


if __name__ == "__main__":
    key = jax.random.PRNGKey(0)
    kx, kp = jax.random.split(key)

    # Conv2d(in_channels=4, out_channels=8, kernel_size=3, stride=1,
    #        padding=1, dilation=1, groups=1, bias=False) -- default FP path
    x = jax.random.normal(kx, (2, 4, 16, 16), dtype=jnp.float32)
    weight, bias = init_conv_params(kp, 4, 8, 3, groups=1, bias=False)

    out = conv2d_pallas(x, weight, bias=bias, stride=(1, 1), padding=(1, 1),
                        dilation=(1, 1), groups=1)
    out = jax.block_until_ready(out)
    assert out.shape == (2, 8, 16, 16) and out.dtype == jnp.float32

    ref = lax.conv_general_dilated(
        x, weight, window_strides=(1, 1), padding=((1, 1), (1, 1)),
        rhs_dilation=(1, 1), dimension_numbers=("NCHW", "OIHW", "NCHW"))
    assert jnp.allclose(out, ref, atol=1e-3, rtol=1e-3), \
        float(jnp.max(jnp.abs(out - ref)))

    # Grouped + biased configuration (exercises the group grid axis and bias).
    kx2, kp2 = jax.random.split(kp)
    x2 = jax.random.normal(kx2, (2, 4, 8, 8), dtype=jnp.float32)
    w2, b2 = init_conv_params(kp2, 4, 8, 3, groups=2, bias=True)
    out2 = conv2d_pallas(x2, w2, bias=b2, stride=(1, 1), padding=(1, 1),
                         dilation=(1, 1), groups=2)
    out2 = jax.block_until_ready(out2)
    assert out2.shape == (2, 8, 8, 8)
    ref2 = lax.conv_general_dilated(
        x2, w2, window_strides=(1, 1), padding=((1, 1), (1, 1)),
        rhs_dilation=(1, 1), dimension_numbers=("NCHW", "OIHW", "NCHW"),
        feature_group_count=2) + b2.reshape(1, -1, 1, 1)
    assert jnp.allclose(out2, ref2, atol=1e-3, rtol=1e-3), \
        float(jnp.max(jnp.abs(out2 - ref2)))

    print("KERNEL_OK")
</pallas_src>

<mosaic_0001>
module attributes {stable_mosaic.version = 11 : i64} {
  func.func @kernel(%arg0: i32, %arg1: i32, %arg2: i32, %arg3: memref<1x1x18x18x4xf32, #tpu.memory_space<vmem>>, %arg4: memref<1x9x4x128xf32, #tpu.memory_space<vmem>>, %arg5: memref<1x1x16x16x128xf32, #tpu.memory_space<vmem>>) attributes {dimension_semantics = [#tpu.dimension_semantics<parallel>, #tpu.dimension_semantics<arbitrary>, #tpu.dimension_semantics<arbitrary>], iteration_bounds = array<i64: 2, 1, 1>, scalar_prefetch = 0 : i64, scratch_operands = 0 : i64, tpu.core_type = #tpu.core_type<tc>, window_params = [{transform_indices = @transform_0, window_bounds = array<i64: 1, 1, 18, 18, 4>}, {transform_indices = @transform_1, window_bounds = array<i64: 1, 9, 4, 128>}, {transform_indices = @transform_2, window_bounds = array<i64: 1, 1, 16, 16, 128>}]} {
    %c16_i32 = arith.constant 16 : i32
    %0 = arith.muli %arg2, %c16_i32 : i32
    %1 = tpu.assume_multiple %0, 16 : i32
    %cst = arith.constant 0.000000e+00 : f32
    %2 = vector.broadcast %cst : f32 to vector<16x16x128xf32>
    %c0 = arith.constant 0 : index
    %c0_0 = arith.constant 0 : index
    %c0_1 = arith.constant 0 : index
    %c0_2 = arith.constant 0 : index
    %c0_3 = arith.constant 0 : index
    %3 = vector.load %arg5[%c0, %c0_0, %c0_1, %c0_2, %c0_3] : memref<1x1x16x16x128xf32, #tpu.memory_space<vmem>>, vector<1x1x16x16x128xf32>
    %4 = vector.shape_cast %3 : vector<1x1x16x16x128xf32> to vector<16x16x128xf32>
    %5 = vector.shape_cast %2 : vector<16x16x128xf32> to vector<1x1x16x16x128xf32>
    tpu.vector_store %arg5[%c0, %c0_0, %c0_1, %c0_2, %c0_3], %5 {strides = array<i32>} : memref<1x1x16x16x128xf32, #tpu.memory_space<vmem>>, vector<1x1x16x16x128xf32>,
    %c0_i32 = arith.constant 0 : i32
    %6 = arith.addi %1, %c0_i32 : i32
    %c0_4 = arith.constant 0 : index
    %c0_5 = arith.constant 0 : index
    %7 = arith.index_cast %6 : i32 to index
    %c0_6 = arith.constant 0 : index
    %c0_7 = arith.constant 0 : index
    %8 = vector.load %arg3[%c0_4, %c0_5, %7, %c0_6, %c0_7] : memref<1x1x18x18x4xf32, #tpu.memory_space<vmem>>, vector<1x1x16x18x4xf32>
    %9 = vector.shape_cast %8 : vector<1x1x16x18x4xf32> to vector<16x18x4xf32>
    %10 = vector.extract_strided_slice %9 {offsets = [0, 0, 0], sizes = [16, 16, 4], strides = [1, 1, 1]} : vector<16x18x4xf32> to vector<16x16x4xf32>
    %11 = vector.shape_cast %10 : vector<16x16x4xf32> to vector<256x4xf32>
    %c0_8 = arith.constant 0 : index
    %c0_9 = arith.constant 0 : index
    %c0_10 = arith.constant 0 : index
    %c0_11 = arith.constant 0 : index
    %12 = vector.load %arg4[%c0_8, %c0_9, %c0_10, %c0_11] : memref<1x9x4x128xf32, #tpu.memory_space<vmem>>, vector<1x1x4x128xf32>
    %13 = vector.shape_cast %12 : vector<1x1x4x128xf32> to vector<4x128xf32>
    %c0_12 = arith.constant 0 : index
    %c0_13 = arith.constant 0 : index
    %c0_14 = arith.constant 0 : index
    %c0_15 = arith.constant 0 : index
    %c0_16 = arith.constant 0 : index
    %14 = vector.load %arg5[%c0_12, %c0_13, %c0_14, %c0_15, %c0_16] : memref<1x1x16x16x128xf32, #tpu.memory_space<vmem>>, vector<1x1x16x16x128xf32>
    %15 = vector.shape_cast %14 : vector<1x1x16x16x128xf32> to vector<16x16x128xf32>
    %cst_17 = arith.constant dense<0.000000e+00> : vector<256x128xf32>
    %16 = tpu.matmul %11, %13, %cst_17 {dimension_numbers = #tpu.dot_dimension_numbers<[1], [0], [0], [1], [0, 0, 1, 1], [], []>} : vector<256x4xf32>, vector<4x128xf32>, vector<256x128xf32> -> vector<256x128xf32>
    %17 = vector.shape_cast %16 : vector<256x128xf32> to vector<16x16x128xf32>
    %18 = arith.addf %15, %17 : vector<16x16x128xf32>
    %c0_18 = arith.constant 0 : index
    %c0_19 = arith.constant 0 : index
    %c0_20 = arith.constant 0 : index
    %c0_21 = arith.constant 0 : index
    %c0_22 = arith.constant 0 : index
    %19 = vector.load %arg5[%c0_18, %c0_19, %c0_20, %c0_21, %c0_22] : memref<1x1x16x16x128xf32, #tpu.memory_space<vmem>>, vector<1x1x16x16x128xf32>
    %20 = vector.shape_cast %19 : vector<1x1x16x16x128xf32> to vector<16x16x128xf32>
    %21 = vector.shape_cast %18 : vector<16x16x128xf32> to vector<1x1x16x16x128xf32>
    tpu.vector_store %arg5[%c0_18, %c0_19, %c0_20, %c0_21, %c0_22], %21 {strides = array<i32>} : memref<1x1x16x16x128xf32, #tpu.memory_space<vmem>>, vector<1x1x16x16x128xf32>,
    %22 = vector.extract_strided_slice %9 {offsets = [0, 1, 0], sizes = [16, 16, 4], strides = [1, 1, 1]} : vector<16x18x4xf32> to vector<16x16x4xf32>
    %23 = vector.shape_cast %22 : vector<16x16x4xf32> to vector<256x4xf32>
    %c0_23 = arith.constant 0 : index
    %c1 = arith.constant 1 : index
    %c0_24 = arith.constant 0 : index
    %c0_25 = arith.constant 0 : index
    %24 = vector.load %arg4[%c0_23, %c1, %c0_24, %c0_25] : memref<1x9x4x128xf32, #tpu.memory_space<vmem>>, vector<1x1x4x128xf32>
    %25 = vector.shape_cast %24 : vector<1x1x4x128xf32> to vector<4x128xf32>
    %c0_26 = arith.constant 0 : index
    %c0_27 = arith.constant 0 : index
    %c0_28 = arith.constant 0 : index
    %c0_29 = arith.constant 0 : index
    %c0_30 = arith.constant 0 : index
    %26 = vector.load %arg5[%c0_26, %c0_27, %c0_28, %c0_29, %c0_30] : memref<1x1x16x16x128xf32, #tpu.memory_space<vmem>>, vector<1x1x16x16x128xf32>
    %27 = vector.shape_cast %26 : vector<1x1x16x16x128xf32> to vector<16x16x128xf32>
    %cst_31 = arith.constant dense<0.000000e+00> : vector<256x128xf32>
    %28 = tpu.matmul %23, %25, %cst_31 {dimension_numbers = #tpu.dot_dimension_numbers<[1], [0], [0], [1], [0, 0, 1, 1], [], []>} : vector<256x4xf32>, vector<4x128xf32>, vector<256x128xf32> -> vector<256x128xf32>
    %29 = vector.shape_cast %28 : vector<256x128xf32> to vector<16x16x128xf32>
    %30 = arith.addf %27, %29 : vector<16x16x128xf32>
    %c0_32 = arith.constant 0 : index
    %c0_33 = arith.constant 0 : index
    %c0_34 = arith.constant 0 : index
    %c0_35 = arith.constant 0 : index
    %c0_36 = arith.constant 0 : index
    %31 = vector.load %arg5[%c0_32, %c0_33, %c0_34, %c0_35, %c0_36] : memref<1x1x16x16x128xf32, #tpu.memory_space<vmem>>, vector<1x1x16x16x128xf32>
    %32 = vector.shape_cast %31 : vector<1x1x16x16x128xf32> to vector<16x16x128xf32>
    %33 = vector.shape_cast %30 : vector<16x16x128xf32> to vector<1x1x16x16x128xf32>
    tpu.vector_store %arg5[%c0_32, %c0_33, %c0_34, %c0_35, %c0_36], %33 {strides = array<i32>} : memref<1x1x16x16x128xf32, #tpu.memory_space<vmem>>, vector<1x1x16x16x128xf32>,
    %34 = vector.extract_strided_slice %9 {offsets = [0, 2, 0], sizes = [16, 16, 4], strides = [1, 1, 1]} : vector<16x18x4xf32> to vector<16x16x4xf32>
    %35 = vector.shape_cast %34 : vector<16x16x4xf32> to vector<256x4xf32>
    %c0_37 = arith.constant 0 : index
    %c2 = arith.constant 2 : index
    %c0_38 = arith.constant 0 : index
    %c0_39 = arith.constant 0 : index
    %36 = vector.load %arg4[%c0_37, %c2, %c0_38, %c0_39] : memref<1x9x4x128xf32, #tpu.memory_space<vmem>>, vector<1x1x4x128xf32>
    %37 = vector.shape_cast %36 : vector<1x1x4x128xf32> to vector<4x128xf32>
    %c0_40 = arith.constant 0 : index
    %c0_41 = arith.constant 0 : index
    %c0_42 = arith.constant 0 : index
    %c0_43 = arith.constant 0 : index
    %c0_44 = arith.constant 0 : index
    %38 = vector.load %arg5[%c0_40, %c0_41, %c0_42, %c0_43, %c0_44] : memref<1x1x16x16x128xf32, #tpu.memory_space<vmem>>, vector<1x1x16x16x128xf32>
    %39 = vector.shape_cast %38 : vector<1x1x16x16x128xf32> to vector<16x16x128xf32>
    %cst_45 = arith.constant dense<0.000000e+00> : vector<256x128xf32>
    %40 = tpu.matmul %35, %37, %cst_45 {dimension_numbers = #tpu.dot_dimension_numbers<[1], [0], [0], [1], [0, 0, 1, 1], [], []>} : vector<256x4xf32>, vector<4x128xf32>, vector<256x128xf32> -> vector<256x128xf32>
    %41 = vector.shape_cast %40 : vector<256x128xf32> to vector<16x16x128xf32>
    %42 = arith.addf %39, %41 : vector<16x16x128xf32>
    %c0_46 = arith.constant 0 : index
    %c0_47 = arith.constant 0 : index
    %c0_48 = arith.constant 0 : index
    %c0_49 = arith.constant 0 : index
    %c0_50 = arith.constant 0 : index
    %43 = vector.load %arg5[%c0_46, %c0_47, %c0_48, %c0_49, %c0_50] : memref<1x1x16x16x128xf32, #tpu.memory_space<vmem>>, vector<1x1x16x16x128xf32>
    %44 = vector.shape_cast %43 : vector<1x1x16x16x128xf32> to vector<16x16x128xf32>
    %45 = vector.shape_cast %42 : vector<16x16x128xf32> to vector<1x1x16x16x128xf32>
    tpu.vector_store %arg5[%c0_46, %c0_47, %c0_48, %c0_49, %c0_50], %45 {strides = array<i32>} : memref<1x1x16x16x128xf32, #tpu.memory_space<vmem>>, vector<1x1x16x16x128xf32>,
    %c1_i32 = arith.constant 1 : i32
    %46 = arith.addi %1, %c1_i32 : i32
    %c0_51 = arith.constant 0 : index
    %c0_52 = arith.constant 0 : index
    %47 = arith.index_cast %46 : i32 to index
    %c0_53 = arith.constant 0 : index
    %c0_54 = arith.constant 0 : index
    %48 = vector.load %arg3[%c0_51, %c0_52, %47, %c0_53, %c0_54] : memref<1x1x18x18x4xf32, #tpu.memory_space<vmem>>, vector<1x1x16x18x4xf32>
    %49 = vector.shape_cast %48 : vector<1x1x16x18x4xf32> to vector<16x18x4xf32>
    %50 = vector.extract_strided_slice %49 {offsets = [0, 0, 0], sizes = [16, 16, 4], strides = [1, 1, 1]} : vector<16x18x4xf32> to vector<16x16x4xf32>
    %51 = vector.shape_cast %50 : vector<16x16x4xf32> to vector<256x4xf32>
    %c0_55 = arith.constant 0 : index
    %c3 = arith.constant 3 : index
    %c0_56 = arith.constant 0 : index
    %c0_57 = arith.constant 0 : index
    %52 = vector.load %arg4[%c0_55, %c3, %c0_56, %c0_57] : memref<1x9x4x128xf32, #tpu.memory_space<vmem>>, vector<1x1x4x128xf32>
    %53 = vector.shape_cast %52 : vector<1x1x4x128xf32> to vector<4x128xf32>
    %c0_58 = arith.constant 0 : index
    %c0_59 = arith.constant 0 : index
    %c0_60 = arith.constant 0 : index
    %c0_61 = arith.constant 0 : index
    %c0_62 = arith.constant 0 : index
    %54 = vector.load %arg5[%c0_58, %c0_59, %c0_60, %c0_61, %c0_62] : memref<1x1x16x16x128xf32, #tpu.memory_space<vmem>>, vector<1x1x16x16x128xf32>
    %55 = vector.shape_cast %54 : vector<1x1x16x16x128xf32> to vector<16x16x128xf32>
    %cst_63 = arith.constant dense<0.000000e+00> : vector<256x128xf32>
    %56 = tpu.matmul %51, %53, %cst_63 {dimension_numbers = #tpu.dot_dimension_numbers<[1], [0], [0], [1], [0, 0, 1, 1], [], []>} : vector<256x4xf32>, vector<4x128xf32>, vector<256x128xf32> -> vector<256x128xf32>
    %57 = vector.shape_cast %56 : vector<256x128xf32> to vector<16x16x128xf32>
    %58 = arith.addf %55, %57 : vector<16x16x128xf32>
    %c0_64 = arith.constant 0 : index
    %c0_65 = arith.constant 0 : index
    %c0_66 = arith.constant 0 : index
    %c0_67 = arith.constant 0 : index
    %c0_68 = arith.constant 0 : index
    %59 = vector.load %arg5[%c0_64, %c0_65, %c0_66, %c0_67, %c0_68] : memref<1x1x16x16x128xf32, #tpu.memory_space<vmem>>, vector<1x1x16x16x128xf32>
    %60 = vector.shape_cast %59 : vector<1x1x16x16x128xf32> to vector<16x16x128xf32>
    %61 = vector.shape_cast %58 : vector<16x16x128xf32> to vector<1x1x16x16x128xf32>
    tpu.vector_store %arg5[%c0_64, %c0_65, %c0_66, %c0_67, %c0_68], %61 {strides = array<i32>} : memref<1x1x16x16x128xf32, #tpu.memory_space<vmem>>, vector<1x1x16x16x128xf32>,
    %62 = vector.extract_strided_slice %49 {offsets = [0, 1, 0], sizes = [16, 16, 4], strides = [1, 1, 1]} : vector<16x18x4xf32> to vector<16x16x4xf32>
    %63 = vector.shape_cast %62 : vector<16x16x4xf32> to vector<256x4xf32>
    %c0_69 = arith.constant 0 : index
    %c4 = arith.constant 4 : index
    %c0_70 = arith.constant 0 : index
    %c0_71 = arith.constant 0 : index
    %64 = vector.load %arg4[%c0_69, %c4, %c0_70, %c0_71] : memref<1x9x4x128xf32, #tpu.memory_space<vmem>>, vector<1x1x4x128xf32>
    %65 = vector.shape_cast %64 : vector<1x1x4x128xf32> to vector<4x128xf32>
    %c0_72 = arith.constant 0 : index
    %c0_73 = arith.constant 0 : index
    %c0_74 = arith.constant 0 : index
    %c0_75 = arith.constant 0 : index
    %c0_76 = arith.constant 0 : index
    %66 = vector.load %arg5[%c0_72, %c0_73, %c0_74, %c0_75, %c0_76] : memref<1x1x16x16x128xf32, #tpu.memory_space<vmem>>, vector<1x1x16x16x128xf32>
    %67 = vector.shape_cast %66 : vector<1x1x16x16x128xf32> to vector<16x16x128xf32>
    %cst_77 = arith.constant dense<0.000000e+00> : vector<256x128xf32>
    %68 = tpu.matmul %63, %65, %cst_77 {dimension_numbers = #tpu.dot_dimension_numbers<[1], [0], [0], [1], [0, 0, 1, 1], [], []>} : vector<256x4xf32>, vector<4x128xf32>, vector<256x128xf32> -> vector<256x128xf32>
    %69 = vector.shape_cast %68 : vector<256x128xf32> to vector<16x16x128xf32>
    %70 = arith.addf %67, %69 : vector<16x16x128xf32>
    %c0_78 = arith.constant 0 : index
    %c0_79 = arith.constant 0 : index
    %c0_80 = arith.constant 0 : index
    %c0_81 = arith.constant 0 : index
    %c0_82 = arith.constant 0 : index
    %71 = vector.load %arg5[%c0_78, %c0_79, %c0_80, %c0_81, %c0_82] : memref<1x1x16x16x128xf32, #tpu.memory_space<vmem>>, vector<1x1x16x16x128xf32>
    %72 = vector.shape_cast %71 : vector<1x1x16x16x128xf32> to vector<16x16x128xf32>
    %73 = vector.shape_cast %70 : vector<16x16x128xf32> to vector<1x1x16x16x128xf32>
    tpu.vector_store %arg5[%c0_78, %c0_79, %c0_80, %c0_81, %c0_82], %73 {strides = array<i32>} : memref<1x1x16x16x128xf32, #tpu.memory_space<vmem>>, vector<1x1x16x16x128xf32>,
    %74 = vector.extract_strided_slice %49 {offsets = [0, 2, 0], sizes = [16, 16, 4], strides = [1, 1, 1]} : vector<16x18x4xf32> to vector<16x16x4xf32>
    %75 = vector.shape_cast %74 : vector<16x16x4xf32> to vector<256x4xf32>
    %c0_83 = arith.constant 0 : index
    %c5 = arith.constant 5 : index
    %c0_84 = arith.constant 0 : index
    %c0_85 = arith.constant 0 : index
    %76 = vector.load %arg4[%c0_83, %c5, %c0_84, %c0_85] : memref<1x9x4x128xf32, #tpu.memory_space<vmem>>, vector<1x1x4x128xf32>
    %77 = vector.shape_cast %76 : vector<1x1x4x128xf32> to vector<4x128xf32>
    %c0_86 = arith.constant 0 : index
    %c0_87 = arith.constant 0 : index
    %c0_88 = arith.constant 0 : index
    %c0_89 = arith.constant 0 : index
    %c0_90 = arith.constant 0 : index
    %78 = vector.load %arg5[%c0_86, %c0_87, %c0_88, %c0_89, %c0_90] : memref<1x1x16x16x128xf32, #tpu.memory_space<vmem>>, vector<1x1x16x16x128xf32>
    %79 = vector.shape_cast %78 : vector<1x1x16x16x128xf32> to vector<16x16x128xf32>
    %cst_91 = arith.constant dense<0.000000e+00> : vector<256x128xf32>
    %80 = tpu.matmul %75, %77, %cst_91 {dimension_numbers = #tpu.dot_dimension_numbers<[1], [0], [0], [1], [0, 0, 1, 1], [], []>} : vector<256x4xf32>, vector<4x128xf32>, vector<256x128xf32> -> vector<256x128xf32>
    %81 = vector.shape_cast %80 : vector<256x128xf32> to vector<16x16x128xf32>
    %82 = arith.addf %79, %81 : vector<16x16x128xf32>
    %c0_92 = arith.constant 0 : index
    %c0_93 = arith.constant 0 : index
    %c0_94 = arith.constant 0 : index
    %c0_95 = arith.constant 0 : index
    %c0_96 = arith.constant 0 : index
    %83 = vector.load %arg5[%c0_92, %c0_93, %c0_94, %c0_95, %c0_96] : memref<1x1x16x16x128xf32, #tpu.memory_space<vmem>>, vector<1x1x16x16x128xf32>
    %84 = vector.shape_cast %83 : vector<1x1x16x16x128xf32> to vector<16x16x128xf32>
    %85 = vector.shape_cast %82 : vector<16x16x128xf32> to vector<1x1x16x16x128xf32>
    tpu.vector_store %arg5[%c0_92, %c0_93, %c0_94, %c0_95, %c0_96], %85 {strides = array<i32>} : memref<1x1x16x16x128xf32, #tpu.memory_space<vmem>>, vector<1x1x16x16x128xf32>,
    %c2_i32 = arith.constant 2 : i32
    %86 = arith.addi %1, %c2_i32 : i32
    %c0_97 = arith.constant 0 : index
    %c0_98 = arith.constant 0 : index
    %87 = arith.index_cast %86 : i32 to index
    %c0_99 = arith.constant 0 : index
    %c0_100 = arith.constant 0 : index
    %88 = vector.load %arg3[%c0_97, %c0_98, %87, %c0_99, %c0_100] : memref<1x1x18x18x4xf32, #tpu.memory_space<vmem>>, vector<1x1x16x18x4xf32>
    %89 = vector.shape_cast %88 : vector<1x1x16x18x4xf32> to vector<16x18x4xf32>
    %90 = vector.extract_strided_slice %89 {offsets = [0, 0, 0], sizes = [16, 16, 4], strides = [1, 1, 1]} : vector<16x18x4xf32> to vector<16x16x4xf32>
    %91 = vector.shape_cast %90 : vector<16x16x4xf32> to vector<256x4xf32>
    %c0_101 = arith.constant 0 : index
    %c6 = arith.constant 6 : index
    %c0_102 = arith.constant 0 : index
    %c0_103 = arith.constant 0 : index
    %92 = vector.load %arg4[%c0_101, %c6, %c0_102, %c0_103] : memref<1x9x4x128xf32, #tpu.memory_space<vmem>>, vector<1x1x4x128xf32>
    %93 = vector.shape_cast %92 : vector<1x1x4x128xf32> to vector<4x128xf32>
    %c0_104 = arith.constant 0 : index
    %c0_105 = arith.constant 0 : index
    %c0_106 = arith.constant 0 : index
    %c0_107 = arith.constant 0 : index
    %c0_108 = arith.constant 0 : index
    %94 = vector.load %arg5[%c0_104, %c0_105, %c0_106, %c0_107, %c0_108] : memref<1x1x16x16x128xf32, #tpu.memory_space<vmem>>, vector<1x1x16x16x128xf32>
    %95 = vector.shape_cast %94 : vector<1x1x16x16x128xf32> to vector<16x16x128xf32>
    %cst_109 = arith.constant dense<0.000000e+00> : vector<256x128xf32>
    %96 = tpu.matmul %91, %93, %cst_109 {dimension_numbers = #tpu.dot_dimension_numbers<[1], [0], [0], [1], [0, 0, 1, 1], [], []>} : vector<256x4xf32>, vector<4x128xf32>, vector<256x128xf32> -> vector<256x128xf32>
    %97 = vector.shape_cast %96 : vector<256x128xf32> to vector<16x16x128xf32>
    %98 = arith.addf %95, %97 : vector<16x16x128xf32>
    %c0_110 = arith.constant 0 : index
    %c0_111 = arith.constant 0 : index
    %c0_112 = arith.constant 0 : index
    %c0_113 = arith.constant 0 : index
    %c0_114 = arith.constant 0 : index
    %99 = vector.load %arg5[%c0_110, %c0_111, %c0_112, %c0_113, %c0_114] : memref<1x1x16x16x128xf32, #tpu.memory_space<vmem>>, vector<1x1x16x16x128xf32>
    %100 = vector.shape_cast %99 : vector<1x1x16x16x128xf32> to vector<16x16x128xf32>
    %101 = vector.shape_cast %98 : vector<16x16x128xf32> to vector<1x1x16x16x128xf32>
    tpu.vector_store %arg5[%c0_110, %c0_111, %c0_112, %c0_113, %c0_114], %101 {strides = array<i32>} : memref<1x1x16x16x128xf32, #tpu.memory_space<vmem>>, vector<1x1x16x16x128xf32>,
    %102 = vector.extract_strided_slice %89 {offsets = [0, 1, 0], sizes = [16, 16, 4], strides = [1, 1, 1]} : vector<16x18x4xf32> to vector<16x16x4xf32>
    %103 = vector.shape_cast %102 : vector<16x16x4xf32> to vector<256x4xf32>
    %c0_115 = arith.constant 0 : index
    %c7 = arith.constant 7 : index
    %c0_116 = arith.constant 0 : index
    %c0_117 = arith.constant 0 : index
    %104 = vector.load %arg4[%c0_115, %c7, %c0_116, %c0_117] : memref<1x9x4x128xf32, #tpu.memory_space<vmem>>, vector<1x1x4x128xf32>
    %105 = vector.shape_cast %104 : vector<1x1x4x128xf32> to vector<4x128xf32>
    %c0_118 = arith.constant 0 : index
    %c0_119 = arith.constant 0 : index
    %c0_120 = arith.constant 0 : index
    %c0_121 = arith.constant 0 : index
    %c0_122 = arith.constant 0 : index
    %106 = vector.load %arg5[%c0_118, %c0_119, %c0_120, %c0_121, %c0_122] : memref<1x1x16x16x128xf32, #tpu.memory_space<vmem>>, vector<1x1x16x16x128xf32>
    %107 = vector.shape_cast %106 : vector<1x1x16x16x128xf32> to vector<16x16x128xf32>
    %cst_123 = arith.constant dense<0.000000e+00> : vector<256x128xf32>
    %108 = tpu.matmul %103, %105, %cst_123 {dimension_numbers = #tpu.dot_dimension_numbers<[1], [0], [0], [1], [0, 0, 1, 1], [], []>} : vector<256x4xf32>, vector<4x128xf32>, vector<256x128xf32> -> vector<256x128xf32>
    %109 = vector.shape_cast %108 : vector<256x128xf32> to vector<16x16x128xf32>
    %110 = arith.addf %107, %109 : vector<16x16x128xf32>
    %c0_124 = arith.constant 0 : index
    %c0_125 = arith.constant 0 : index
    %c0_126 = arith.constant 0 : index
    %c0_127 = arith.constant 0 : index
    %c0_128 = arith.constant 0 : index
    %111 = vector.load %arg5[%c0_124, %c0_125, %c0_126, %c0_127, %c0_128] : memref<1x1x16x16x128xf32, #tpu.memory_space<vmem>>, vector<1x1x16x16x128xf32>
    %112 = vector.shape_cast %111 : vector<1x1x16x16x128xf32> to vector<16x16x128xf32>
    %113 = vector.shape_cast %110 : vector<16x16x128xf32> to vector<1x1x16x16x128xf32>
    tpu.vector_store %arg5[%c0_124, %c0_125, %c0_126, %c0_127, %c0_128], %113 {strides = array<i32>} : memref<1x1x16x16x128xf32, #tpu.memory_space<vmem>>, vector<1x1x16x16x128xf32>,
    %114 = vector.extract_strided_slice %89 {offsets = [0, 2, 0], sizes = [16, 16, 4], strides = [1, 1, 1]} : vector<16x18x4xf32> to vector<16x16x4xf32>
    %115 = vector.shape_cast %114 : vector<16x16x4xf32> to vector<256x4xf32>
    %c0_129 = arith.constant 0 : index
    %c8 = arith.constant 8 : index
    %c0_130 = arith.constant 0 : index
    %c0_131 = arith.constant 0 : index
    %116 = vector.load %arg4[%c0_129, %c8, %c0_130, %c0_131] : memref<1x9x4x128xf32, #tpu.memory_space<vmem>>, vector<1x1x4x128xf32>
    %117 = vector.shape_cast %116 : vector<1x1x4x128xf32> to vector<4x128xf32>
    %c0_132 = arith.constant 0 : index
    %c0_133 = arith.constant 0 : index
    %c0_134 = arith.constant 0 : index
    %c0_135 = arith.constant 0 : index
    %c0_136 = arith.constant 0 : index
    %118 = vector.load %arg5[%c0_132, %c0_133, %c0_134, %c0_135, %c0_136] : memref<1x1x16x16x128xf32, #tpu.memory_space<vmem>>, vector<1x1x16x16x128xf32>
    %119 = vector.shape_cast %118 : vector<1x1x16x16x128xf32> to vector<16x16x128xf32>
    %cst_137 = arith.constant dense<0.000000e+00> : vector<256x128xf32>
    %120 = tpu.matmul %115, %117, %cst_137 {dimension_numbers = #tpu.dot_dimension_numbers<[1], [0], [0], [1], [0, 0, 1, 1], [], []>} : vector<256x4xf32>, vector<4x128xf32>, vector<256x128xf32> -> vector<256x128xf32>
    %121 = vector.shape_cast %120 : vector<256x128xf32> to vector<16x16x128xf32>
    %122 = arith.addf %119, %121 : vector<16x16x128xf32>
    %c0_138 = arith.constant 0 : index
    %c0_139 = arith.constant 0 : index
    %c0_140 = arith.constant 0 : index
    %c0_141 = arith.constant 0 : index
    %c0_142 = arith.constant 0 : index
    %123 = vector.load %arg5[%c0_138, %c0_139, %c0_140, %c0_141, %c0_142] : memref<1x1x16x16x128xf32, #tpu.memory_space<vmem>>, vector<1x1x16x16x128xf32>
    %124 = vector.shape_cast %123 : vector<1x1x16x16x128xf32> to vector<16x16x128xf32>
    %125 = vector.shape_cast %122 : vector<16x16x128xf32> to vector<1x1x16x16x128xf32>
    tpu.vector_store %arg5[%c0_138, %c0_139, %c0_140, %c0_141, %c0_142], %125 {strides = array<i32>} : memref<1x1x16x16x128xf32, #tpu.memory_space<vmem>>, vector<1x1x16x16x128xf32>,
    return
  }
  func.func @transform_0(%arg0: i32, %arg1: i32, %arg2: i32) -> (i32, i32, i32, i32, i32) {
    %c0_i32 = arith.constant 0 : i32
    %c0_i32_0 = arith.constant 0 : i32
    %c0_i32_1 = arith.constant 0 : i32
    %c0_i32_2 = arith.constant 0 : i32
    return %arg1, %arg0, %c0_i32, %c0_i32_0, %c0_i32_1 : i32, i32, i32, i32, i32
  }
  func.func @transform_1(%arg0: i32, %arg1: i32, %arg2: i32) -> (i32, i32, i32, i32) {
    %c0_i32 = arith.constant 0 : i32
    %c0_i32_0 = arith.constant 0 : i32
    %c0_i32_1 = arith.constant 0 : i32
    %c0_i32_2 = arith.constant 0 : i32
    return %arg1, %c0_i32, %c0_i32_0, %c0_i32_1 : i32, i32, i32, i32
  }
  func.func @transform_2(%arg0: i32, %arg1: i32, %arg2: i32) -> (i32, i32, i32, i32, i32) {
    %c0_i32 = arith.constant 0 : i32
    %c0_i32_0 = arith.constant 0 : i32
    %c0_i32_1 = arith.constant 0 : i32
    return %arg1, %arg0, %arg2, %c0_i32, %c0_i32_0 : i32, i32, i32, i32, i32
  }
}

</mosaic_0001>

<bundles_post_ra>
// kernel: tpu_custom_call.1
= control target key start
LH: loop header
LB: loop body
LE: loop exit
PB: predicated region body
PF: predicated region fallthrough
CT: control target
= control target key end

     0   :  { %7 = vsyncpa [#allocation3], 0  ;;  %s7946_s0 = inlined_call_operand.vmem [shape: f32[1,2,18,18,4], index: 0, kind: input, shape index: {}]   ;;  %s7947_s1 = inlined_call_operand.vmem [shape: f32[1,9,4,128], index: 1, kind: input, shape index: {}]   ;;  %s7948_s2 = inlined_call_operand.hbm [shape: f32[1,2,16,16,128], index: 2, kind: output, shape index: {}]  }
   0x1   :  { %9 = vsyncpa [#allocation3 + $0x1], 0  ;;  %s6414_s9 = smov 0   ;;  %s6416_s10 = smov 0  }
   0x2   :  { %s6418_s11 = smov 0   ;;  %s6420_s12 = smov 0  }
   0x3   :  { %s6422_s13 = smov 0   ;;  %s6424_s14 = smov 0  }
   0x4 LB: > { %s4653_s15 = sadd.s32 4294967295, %s6394_s14   ;;  %s4654_s16 = sadd.s32 4294967294, %s6394_s14   ;;  %s6394_s14 = sphi %s6424_s14, %s15_s14   ;;  %s6390_s13 = sphi %s6422_s13, %s8160_s13   ;;  %s6386_s12 = sphi %s6420_s12, %s8159_s12   ;;  %s6382_s11 = sphi %s6418_s11, %s8158_s11   ;;  %s6378_s10 = sphi %s6416_s10, %s8157_s10   ;;  %s6374_s9 = sphi %s6414_s9, %s8156_s9  }
   0x5   : > { %s34_s17 = sadd.s32 1, %s6390_s13  ;;  %s99_s18 = sadd.s32 1, %s6382_s11 }
   0x6   : > { %p36_p0 = scmp.ge.s32.totalorder %s34_s17, 2  ;;  %p109_p1 = scmp.ne.s32.totalorder %s6382_s11, %s6378_s10 }
   0x7   : > { %p110_p2 = scmp.eq.s32.totalorder %s4653_s15, 1  ;;  %p115_p3 = scmp.ne.s32.totalorder %s6378_s10, %s6374_s9 }
   0x8   : > { %s8162_s17 = smov (%p36_p0, %s34_s17), 0  ;;  %p116_p5 = scmp.eq.s32.totalorder %s4654_s16, 1 }
   0x9   : > { %p6454_p4 = por %p110_p2, %p109_p1  ;;  %s93_s20 = ssub.s32 %s6390_s13, %s8162_s17 }
   0xa   : > { %p4658_p6 = scmp.ge.s32.totalorder %s6394_s14, 1  ;;  %p97_p7 = scmp.eq.s32.totalorder %s93_s20, 0 }
   0xb   : > { %p6461_p8 = por %p116_p5, %p115_p3  ;;  %p154_p9 = scmp.lt.s32.totalorder %s6394_s14, 3 }
   0xc   : > { %s6467_s22 = scalar_select %p97_p7, %s6382_s11, %s99_s18  }
   0xd   : > { %p155_p10 = pnand %p4658_p6, %p154_p9 }
   0xf   : > { %158 = sbr.rel (%p155_p10) target bundleno = 549 (0x225), region = 28 }
  0x16   : > { %v283_v0 = vld [vmem:[%s7947_s1] sm:$0xf]  ;;  %vm413_vm0 = vcmask 1043456   ;;  %p187_p11 = scmp.lt.s32.totalorder %s6386_s12, 1  ;;  %v4694_v1 = vld [vmem:[%s7947_s1 + $0x4] sm:$0xf] }
  0x17   : > { %5365 = vmatprep.subr.msk.mxu1 %vm413_vm0, %v283_v0  ;;  %v6480_v2 = vld [vmem:[%s7947_s1 + $0x10] sm:$0xf]  ;;  %v4878_v3 = vld [vmem:[%s7947_s1 + $0x14] sm:$0xf]  ;;  %vm316_vm1 = vcmask 31744   ;;  %vm722_vm2 = vcmask 1046528  }
  0x18   : > { %8030 = vst [vmem:[#allocation5_spill] sm:$0xff] %v6480_v2  ;;  %5366 = vmatpush3.msk.msra.mxu1 %vm413_vm0, %v283_v0  ;;  %s188_s3 = scalar_select %p187_p11, %s6386_s12, 1  ;;  %5565 = vmatprep.subr.msk.mxu0 %vm413_vm0, %v6480_v2  ;;  %v6518_v9 = vld [vmem:[%s7947_s1 + $0x8] sm:$0xf]  ;;  %v6583_v29 = vld [vmem:[%s7947_s1 + $0x18] sm:$0xf] }
  0x19   : > { %5415 = vmatprep.subr.msk.mxu1 %vm413_vm0, %v4694_v1  ;;  %5566 = vmatpush3.msk.msra.mxu0 %vm413_vm0, %v6480_v2  ;;  %vm1193_vm3 = vcmask 1045504   ;;  %s182_s30 = sand.u32 1, %s6378_s10   ;;  %s5067_s5 = sshll.u32 %s6386_s12, 12 }
  0x1a   : > { %s6233_s4 = smul.u32 432, %s188_s3  ;;  %5615 = vmatprep.subr.msk.mxu0 %vm413_vm0, %v4878_v3  ;;  %s4659_s3 = sshll.u32 %s182_s30, 8 }
  0x1b   : > { %s7892_s15 = scalar_lea.hbm %s7948_s2, %s5067_s5  ;;  %s7900_s12 = scalar_lea.sflag [#allocation3], %s182_s30 }
  0x1c   : > { %s6496_s7 = scalar_lea.vmem %s7946_s0, %s6233_s4  ;;  %s7855_s4 = scalar_lea.vmem [#allocation2], %s4659_s3 }
  0x1d   : > { %v6499_v4 = vld [vmem:[%s6496_s7] sm:$0xff]  ;;  %v6502_v5 = vld [vmem:[%s6496_s7 + $0x8] sm:$0xff]  ;;  %v6505_v6 = vld [vmem:[%s6496_s7 + $0x18] sm:$0xff]  ;;  %s4541_s6 = sshll.u32 %s7855_s4, 4  ;;  %s6396_s18 = smov [#allocation2]   ;;  %s7894_s6 = int_to_ptr.vmem [resolvable:$true] %s4541_s6 }
  0x1e   : > { %5367 = vmatprep.mubr.msk.f32.mxu1 %vm316_vm1, %v6499_v4  ;;  %v6510_v7 = vld [vmem:[%s6496_s7 + $0x20] sm:$0xff]  ;;  %v6513_v8 = vld [vmem:[%s6496_s7 + $0x30] sm:$0xff]  ;;  %v2153_v10 = vrot.slane %v6505_v6, 1  ;;  %v6527_v12 = vld [vmem:[%s6496_s7 + $0x28] sm:$0x3]  ;;  %s6316_s16 = scalar_lea.vmem %s7894_s6, 4096 }
  0x1f   : > { %8031 = vst [vmem:[#allocation6_spill] sm:$0xff] %v6513_v8  ;;  %5368 = vmatmul.mubr.msk.f32.vlgmr.msra.gmra.mrb[0].mxu1 %vm316_vm1, %v6502_v5  ;;  %v6524_v11 = vrot.slane %v6510_v7, 1  ;;  %v2156_v13 = vrot.slane %v6527_v12, 1  ;;  %v6534_v14 = vld [vmem:[%s6496_s7 + $0x38] sm:$0xff]  ;;  %v2158_v15 = vrot.slane %v6513_v8, 1  ;;  %v6538_v16 = vld [vmem:[%s6496_s7 + $0x48] sm:$0xff]  ;;  %p6317_p12 = scmp.ne.s32.totalorder %s7894_s6, %s6316_s16 }
  0x20   : > { %5416 = vmatpush3.msk.msra.mxu1 %vm413_vm0, %v4694_v1  ;;  %5370 = vmatprep.mubr.msk.f32.mxu1 %vm316_vm1, %v6505_v6  ;;  %v6545_v18 = vrot.slane %v6534_v14, 1  ;;  %v6548_v19 = vld [vmem:[%s6496_s7 + $0x40] sm:$0x3]  ;;  %v6551_v20 = vld [vmem:[%s6496_s7 + $0x50] sm:$0xff]  ;;  %v2163_v21 = vrot.slane %v6538_v16, 1  ;;  %v6578_v28 = vld [vmem:[%s6496_s7 + $0x68] sm:$0xff] }
  0x21   : > { %v6542_v17 = vsel %vm722_vm2, %v2153_v10, %v6524_v11  ;;  %5465 = vmatprep.subr.msk.mxu1 %vm413_vm0, %v6518_v9  ;;  %v2157_v22 = vsel %vm722_vm2, %v6524_v11, %v2156_v13  ;;  %v2161_v23 = vrot.slane %v6548_v19, 1  ;;  %v6562_v24 = vrot.slane %v6551_v20, 1  ;;  %v6565_v25 = vld [vmem:[%s6496_s7 + $0x58] sm:$0x3]  ;;  %v6568_v26 = vld [vmem:[%s6496_s7 + $0x60] sm:$0xff]  ;;  %v6634_v44 = vld [vmem:[%s6496_s7 + $0x90] sm:$0xff]  ;;  %p6318_p13 = pnand %p6317_p12, %p6454_p4 }
  0x22   : > { %5567 = vmatprep.mubr.msk.f32.mxu0 %vm316_vm1, %v6542_v17  ;;  %v6575_v27 = vsel %vm722_vm2, %v2158_v15, %v6545_v18  ;;  %v2166_v31 = vrot.slane %v6565_v25, 1  ;;  %v2168_v33 = vrot.slane %v6568_v26, 1  ;;  %v6599_v34 = vrot.slane %v6578_v28, 1  ;;  %v6602_v35 = vld [vmem:[%s6496_s7 + $0x70] sm:$0x3]  ;;  %v6605_v36 = vld [vmem:[%s6496_s7 + $0x78] sm:$0xff] }
  0x23   : > { %5568 = vmatmul.mubr.msk.f32.vlgmr.msra.gmra.mrb[0].mxu0 %vm316_vm1, %v2157_v22  ;;  %5371 = vmatmul.mubr.msk.f32.gmra.mrb[2].mxu1 %vm316_vm1, %v6510_v7  ;;  %v2162_v30 = vsel %vm722_vm2, %v6545_v18, %v2161_v23  ;;  %v6594_v32 = vsel %vm722_vm2, %v2163_v21, %v6562_v24  ;;  %v6608_v37 = vld [vmem:[%s6496_s7 + $0x80] sm:$0xff]  ;;  %v2171_v39 = vrot.slane %v6602_v35, 1  ;;  %v2173_v41 = vrot.slane %v6605_v36, 1  ;;  %v6631_v43 = vld [vmem:[%s6496_s7 + $0x88] sm:$0x3]  ;;  %v6637_v45 = vld [vmem:[%s6496_s7 + $0x98] sm:$0xff]  ;;  %p6319_p0 = pneg %p6318_p13 }
  0x24   : > { %5570 = vmatprep.mubr.msk.f32.mxu0 %vm316_vm1, %v6575_v27  ;;  %5373 = vmatprep.mubr.msk.f32.mxu1 %vm316_vm1, %v6513_v8  ;;  %8032 = vst [vmem:[#allocation7_spill] sm:$0xff] %v6599_v34  ;;  %8033 = vst [vmem:[#allocation8_spill] sm:$0xff] %v6608_v37  ;;  %v2167_v38 = vsel %vm722_vm2, %v6562_v24, %v2166_v31  ;;  %v6624_v40 = vsel %vm722_vm2, %v2168_v33, %v6599_v34  ;;  %v6628_v42 = vrot.slane %v6608_v37, 1  ;;  %v6658_v51 = vld [vmem:[%s6496_s7 + $0xa0] sm:$0x3]  ;;  %v6661_v52 = vld [vmem:[%s6496_s7 + $0xa8] sm:$0xff] }
  0x25   : > { %5616 = vmatpush3.msk.msra.mxu0 %vm413_vm0, %v4878_v3  ;;  %8034 = vst [vmem:[#allocation9_spill] sm:$0xff] %v6624_v40  ;;  %v2172_v46 = vsel %vm722_vm2, %v6599_v34, %v2171_v39  ;;  %v2176_v47 = vrot.slane %v6631_v43, 1  ;;  %v2178_v49 = vrot.slane %v6634_v44, 1  ;;  %v6655_v50 = vrot.slane %v6637_v45, 1  ;;  %v6664_v53 = vld [vmem:[%s6496_s7 + $0xb0] sm:$0xff]  ;;  %v6688_v60 = vld [vmem:[%s6496_s7 + $0xc0] sm:$0xff] }
  0x26   : > { %5665 = vmatprep.subr.msk.mxu0 %vm413_vm0, %v6583_v29  ;;  %8035 = vst [vmem:[#allocation10_spill] sm:$0xff] %v6628_v42  ;;  %v6651_v48 = vsel %vm722_vm2, %v2173_v41, %v6628_v42  ;;  %v2181_v55 = vrot.slane %v6658_v51, 1  ;;  %v2183_v57 = vrot.slane %v6661_v52, 1  ;;  %v6682_v58 = vrot.slane %v6664_v53, 1  ;;  %v6685_v59 = vld [vmem:[%s6496_s7 + $0xb8] sm:$0x3] }
  0x27   : > { %5571 = vmatmul.mubr.msk.f32.gmra.mrb[2].mxu0 %vm316_vm1, %v2162_v30  ;;  %5374 = vmatmul.mubr.msk.f32.gmra.mrb[4].mxu1 %vm316_vm1, %v6534_v14  ;;  %8036 = vst [vmem:[#allocation11_spill] sm:$0xff] %v6651_v48  ;;  %v2177_v54 = vsel %vm722_vm2, %v6628_v42, %v2176_v47  ;;  %v6678_v56 = vsel %vm722_vm2, %v2178_v49, %v6655_v50  ;;  %v6691_v61 = vld [vmem:[%s6496_s7 + $0xc8] sm:$0xff]  ;;  %v2186_v63 = vrot.slane %v6685_v59, 1  ;;  %v2188_v1 = vrot.slane %v6688_v60, 1  ;;  %v6712_v10 = vld [vmem:[%s6496_s7 + $0xd0] sm:$0x3] }
  0x28   : > { %5573 = vmatprep.mubr.msk.f32.mxu0 %vm316_vm1, %v6594_v32  ;;  %5376 = vmatprep.mubr.msk.f32.mxu1 %vm316_vm1, %v6538_v16  ;;  %8037 = vst [vmem:[#allocation12_spill] sm:$0xff] %v6678_v56  ;;  %v2182_v62 = vsel %vm722_vm2, %v6655_v50, %v2181_v55  ;;  %v6705_v0 = vsel %vm722_vm2, %v2183_v57, %v6682_v58  ;;  %v6709_v3 = vrot.slane %v6691_v61, 1  ;;  %v2191_v15 = vrot.slane %v6712_v10, 1  ;;  %v6761_v39 = vld [vmem:[%s6496_s7 + $0xe0] sm:$0xff]  ;;  %v6790_v57 = vld [vmem:[%s6496_s7 + $0xf8] sm:$0xff]  ;;  %s6320_s20 = sshll.u32 %s6396_s18, 4  ;;  %s6321_s20 = int_to_ptr.vmem [resolvable:$false] %s6320_s20 }
  0x29   : > { %8038 = vst [vmem:[#allocation13_spill] sm:$0xff] %v6705_v0  ;;  %v2187_v13 = vsel %vm722_vm2, %v6682_v58, %v2186_v63  ;;  %v1199_v21 = vrot.slane %v6505_v6, 2  ;;  %v6726_v22 = vrot.slane %v6510_v7, 2  ;;  %v2626_v30 = vrot.slane %v6527_v12, 2  ;;  %s6322_s23 = scalar_lea.vmem %s6321_s20, 8192  ;;  %p6323_p1 = scmp.lt.s32.totalorder %s7894_s6, %s6321_s20 }
  0x2a   : > { %v6730_v23 = vsel %vm722_vm2, %v2188_v1, %v6709_v3  ;;  %v2192_v6 = vsel %vm722_vm2, %v6709_v3, %v2191_v15  ;;  %v7949_v7 = vrot.slane %v6513_v8, 2  ;;  %v1205_v31 = vrot.slane %v6534_v14, 2  ;;  %v6804_v15 = vld [vmem:[%s6496_s7 + $0x108] sm:$0xff]  ;;  %p6324_p2 = scmp.lt.s32.totalorder %s6322_s23, %s6316_s16 }
  0x2b   : > { %5574 = vmatmul.mubr.msk.f32.gmra.mrb[4].mxu0 %vm316_vm1, %v2167_v38  ;;  %5377 = vmatmul.mubr.msk.f32.gmra.mrb[6].mxu1 %vm316_vm1, %v6551_v20  ;;  %v6746_v33 = vsel %vm1193_vm3, %v1199_v21, %v6726_v22  ;;  %v6749_v38 = vld [vmem:[%s6496_s7 + $0xd8] sm:$0xff]  ;;  %v2627_v12 = vsel %vm1193_vm3, %v6726_v22, %v2626_v30  ;;  %v2631_v41 = vrot.slane %v6548_v19, 2  ;;  %v6766_v47 = vrot.slane %v6551_v20, 2  ;;  %v6820_v30 = vld [vmem:[%s6496_s7 + $0x110] sm:$0xff] }
  0x2c   : > { %5576 = vmatprep.mubr.msk.f32.mxu0 %vm316_vm1, %v6624_v40  ;;  %5379 = vmatprep.mubr.msk.f32.mxu1 %vm316_vm1, %v6568_v26  ;;  %8039 = vst [vmem:[#allocation14_spill] sm:$0xff] %v6746_v33  ;;  %v6771_v49 = vsel %vm1193_vm3, %v7949_v7, %v1205_v31  ;;  %v6782_v19 = vld [vmem:[%s7947_s1 + $0x1c] sm:$0xf]  ;;  %v1214_v63 = vrot.slane %v6568_v26, 2  ;;  %v6795_v1 = vrot.slane %v6578_v28, 2  ;;  %v1194_v21 = vrot.slane %v6499_v4, 2  ;;  %p6325_p3 = por %p6324_p2, %p6323_p1 }
  0x2d   : > { %8040 = vst [vmem:[#allocation15_spill] sm:$0xff] %v6766_v47  ;;  %8041 = vst [vmem:[#allocation16_spill] sm:$0xff] %v6771_v49  ;;  %v2632_v55 = vsel %vm1193_vm3, %v1205_v31, %v2631_v41  ;;  %v6825_v41 = vrot.slane %v6608_v37, 2  ;;  %v6835_v7 = vld [vmem:[%s6496_s7 + $0x10] sm:$0x3] }
  0x2e   : > { %8042 = vst [vmem:[#allocation17_spill] sm:$0xff] %v6795_v1  ;;  %p6326_p5 = pnand %p6325_p3, %p6319_p0 }
  0x2f   : > { %5577 = vmatmul.mubr.msk.f32.gmra.mrb[6].mxu0 %vm316_vm1, %v2172_v46  ;;  %5380 = vmatmul.mubr.msk.f32.gmra.mrb[8].mxu1 %vm316_vm1, %v6578_v28  ;;  %v1209_v46 = vrot.slane %v6538_v16, 2  ;;  %8044 = vst [vmem:[#allocation19_spill] sm:$0xff] %v6825_v41 }
  0x30   : > { %5579 = vmatprep.mubr.msk.f32.mxu0 %vm316_vm1, %v6651_v48  ;;  %5382 = vmatprep.mubr.msk.f32.mxu1 %vm316_vm1, %v6605_v36 }
  0x33   : > { %5580 = vmatmul.mubr.msk.f32.gmra.mrb[8].mxu0 %vm316_vm1, %v2177_v54  ;;  %5383 = vmatmul.mubr.msk.f32.gmra.mrb[10].mxu1 %vm316_vm1, %v6608_v37  ;;  %v6774_v54 = vld [vmem:[%s6496_s7 + $0xf0] sm:$0xff] }
  0x34   : > { %5582 = vmatprep.mubr.msk.f32.mxu0 %vm316_vm1, %v6678_v56  ;;  %5385 = vmatprep.mubr.msk.f32.mxu1 %vm316_vm1, %v6634_v44 }
  0x37   : > { %5583 = vmatmul.mubr.msk.f32.gmra.mrb[10].mxu0 %vm316_vm1, %v2182_v62  ;;  %5386 = vmatmul.mubr.msk.f32.gmra.mrb[12].mxu1 %vm316_vm1, %v6637_v45  ;;  %v2636_v62 = vrot.slane %v6565_v25, 2  ;;  %v1195_v25 = vrot.slane %v6502_v5, 2 }
  0x38   : > { %5585 = vmatprep.mubr.msk.f32.mxu0 %vm316_vm1, %v6705_v0  ;;  %5388 = vmatprep.mubr.msk.f32.mxu1 %vm316_vm1, %v6661_v52 }
  0x3b   : > { %5586 = vmatmul.mubr.msk.f32.gmra.mrb[12].mxu0 %vm316_vm1, %v2187_v13  ;;  %5389 = vmatmul.mubr.msk.f32.gmra.mrb[14].mxu1 %vm316_vm1, %v6664_v53  ;;  %v6799_v13 = vsel %vm1193_vm3, %v1209_v46, %v6766_v47  ;;  %v6829_v46 = vsel %vm1193_vm3, %v1214_v63, %v6795_v1 }
  0x3c   : > { %5588 = vmatprep.mubr.msk.f32.mxu0 %vm316_vm1, %v6730_v23  ;;  %5391 = vmatprep.mubr.msk.f32.mxu1 %vm316_vm1, %v6688_v60  ;;  %8043 = vst [vmem:[#allocation18_spill] sm:$0xff] %v6799_v13  ;;  %8045 = vst [vmem:[#allocation20_spill] sm:$0xff] %v6829_v46 }
  0x3f   : > { %5589 = vmatmul.mubr.msk.f32.gmra.mrb[14].mxu0 %vm316_vm1, %v2192_v6  ;;  %5392 = vmatmul.mubr.msk.f32.gmra.mrb[16].mxu1 %vm316_vm1, %v6691_v61  ;;  %v2641_v6 = vrot.slane %v6602_v35, 2  ;;  %v1197_v35 = vrot.slane %v6835_v7, 2 }
  0x40   : > { %5617 = vmatprep.mubr.msk.f32.mxu0 %vm316_vm1, %v6746_v33  ;;  %5394 = vmatprep.mubr.msk.f32.mxu1 %vm316_vm1, %v6749_v38 }
  0x41   : > { %v6862_v2 = vsel %vm1193_vm3, %v1195_v25, %v1197_v35  ;;  %v6898_v35 = vrot.slane %v6664_v53, 2 }
  0x43   : > { %5618 = vmatmul.mubr.msk.f32.vlgmr.msra.gmra.mrb[0].mxu0 %vm316_vm1, %v2627_v12  ;;  %5395 = vmatmul.mubr.msk.f32.gmra.mrb[18].mxu1 %vm316_vm1, %v6761_v39  ;;  %v1219_v12 = vrot.slane %v6605_v36, 2  ;;  %8051 = vst [vmem:[#allocation26_spill] sm:$0xff] %v6898_v35 }
  0x44   : > { %5620 = vmatprep.mubr.msk.f32.mxu0 %vm316_vm1, %v6771_v49  ;;  %5397 = vmatprep.mubr.msk.f32.mxu1 %vm316_vm1, %v6774_v54  ;;  %v6858_v49 = vld [vmem:[%s6496_s7 + $0x128] sm:$0xff] }
  0x45   : > { %5666 = vmatpush3.msk.msra.mxu0 %vm413_vm0, %v6583_v29  ;;  %v2637_v29 = vsel %vm1193_vm3, %v6766_v47, %v2636_v62  ;;  %v6841_v62 = vsel %vm1193_vm3, %v1194_v21, %v1195_v25  ;;  %v6848_v47 = vld [vmem:[%s6496_s7 + $0x40] sm:$0x3]  ;;  %v2642_v21 = vsel %vm1193_vm3, %v6795_v1, %v2641_v6  ;;  %v6871_v37 = vsel %vm1193_vm3, %v1219_v12, %v6825_v41  ;;  %v6874_v6 = vld [vmem:[%s6496_s7 + $0x138] sm:$0xff] }
  0x46   : > { %5715 = vmatprep.subr.msk.mxu0 %vm413_vm0, %v6782_v19  ;;  %8046 = vst [vmem:[#allocation21_spill] sm:$0xff] %v6841_v62  ;;  %v1207_v33 = vrot.slane %v6848_v47, 2  ;;  %v1224_v62 = vrot.slane %v6634_v44, 2  ;;  %8048 = vst [vmem:[#allocation23_spill] sm:$0xff] %v6871_v37  ;;  %v6949_v1 = vrot.slane %v6761_v39, 2 }
  0x47   : > { %5621 = vmatmul.mubr.msk.f32.gmra.mrb[2].mxu0 %vm316_vm1, %v2632_v55  ;;  %5398 = vmatmul.mubr.msk.f32.gmra.mrb[20].mxu1 %vm316_vm1, %v6790_v57  ;;  %v6832_v55 = vld [vmem:[%s6496_s7 + $0x120] sm:$0xff] }
  0x48   : > { %5623 = vmatprep.mubr.msk.f32.mxu0 %vm316_vm1, %v6799_v13  ;;  %5400 = vmatprep.mubr.msk.f32.mxu1 %vm316_vm1, %v6804_v15  ;;  %v6838_v13 = vld [vmem:[%s6496_s7 + $0x28] sm:$0x3]  ;;  %v6881_v25 = vsel %vm1193_vm3, %v1205_v31, %v1207_v33  ;;  %v2651_v31 = vrot.slane %v6658_v51, 2  ;;  %v1229_v33 = vrot.slane %v6661_v52, 2  ;;  %v724_v51 = vrot.slane %v6502_v5, 1 }
  0x49   : > { %v1202_v63 = vrot.slane %v6838_v13, 2  ;;  %8050 = vst [vmem:[#allocation25_spill] sm:$0xff] %v6881_v25 }
  0x4a   : > { %v6928_v5 = vsel %vm1193_vm3, %v1229_v33, %v6898_v35  ;;  %v2661_v33 = vrot.slane %v6712_v10, 2 }
  0x4b   : > { %5624 = vmatmul.mubr.msk.f32.gmra.mrb[4].mxu0 %vm316_vm1, %v2637_v29  ;;  %5401 = vmatmul.mubr.msk.f32.gmra.mrb[22].mxu1 %vm316_vm1, %v6820_v30  ;;  %v2646_v29 = vrot.slane %v6631_v43, 2  ;;  %v6878_v43 = vsel %vm1193_vm3, %v6726_v22, %v1202_v63  ;;  %v6893_v22 = vld [vmem:[%s6496_s7 + $0x140] sm:$0xff]  ;;  %8054 = vst [vmem:[#allocation29_spill] sm:$0xff] %v6928_v5 }
  0x4c   : > { %5626 = vmatprep.mubr.msk.f32.mxu0 %vm316_vm1, %v6829_v46  ;;  %5403 = vmatprep.mubr.msk.f32.mxu1 %vm316_vm1, %v6832_v55  ;;  %v6867_v46 = vrot.slane %v6637_v45, 2  ;;  %8049 = vst [vmem:[#allocation24_spill] sm:$0xff] %v6878_v43  ;;  %v6957_v43 = vld [vmem:[%s6496_s7 + $0xe8] sm:$0x3] }
  0x4d   : > { %v2647_v12 = vsel %vm1193_vm3, %v6825_v41, %v2646_v29  ;;  %v723_v29 = vrot.slane %v6499_v4, 1  ;;  %v6919_v41 = vld [vmem:[%s6496_s7 + $0x158] sm:$0xff]  ;;  %v6924_v4 = vrot.slane %v6691_v61, 2  ;;  %8057 = vst [vmem:[#allocation32_spill] sm:$0xff] %v6957_v43 }
  0x4e   : > { %8047 = vst [vmem:[#allocation22_spill] sm:$0xff] %v6867_v46  ;;  %v6902_v63 = vsel %vm1193_vm3, %v1224_v62, %v6867_v46  ;;  %v2652_v62 = vsel %vm1193_vm3, %v6867_v46, %v2651_v31  ;;  %v6943_v31 = vld [vmem:[%s6496_s7 + $0x170] sm:$0xff]  ;;  %v726_v46 = vrot.slane %v6835_v7, 1  ;;  %v2666_v7 = vrot.slane %v6957_v43, 2 }
  0x4f   : > { %5627 = vmatmul.mubr.msk.f32.gmra.mrb[6].mxu0 %vm316_vm1, %v2642_v21  ;;  %5404 = vmatmul.mubr.msk.f32.gmra.mrb[24].mxu1 %vm316_vm1, %v6858_v49  ;;  %8052 = vst [vmem:[#allocation27_spill] sm:$0xff] %v6902_v63  ;;  %v6905_v21 = vld [vmem:[%s6496_s7 + $0x150] sm:$0xff]  ;;  %8053 = vst [vmem:[#allocation28_spill] sm:$0xff] %v6924_v4  ;;  %v725_v25 = vsel %vm722_vm2, %v723_v29, %v724_v51  ;;  %v2662_v10 = vsel %vm1193_vm3, %v6924_v4, %v2661_v33  ;;  %v731_v29 = vrot.slane %v6838_v13, 1 }
  0x50   : > { %5629 = vmatprep.mubr.msk.f32.mxu0 %vm316_vm1, %v6871_v37  ;;  %5406 = vmatprep.mubr.msk.f32.mxu1 %vm316_vm1, %v6874_v6  ;;  %v1234_v37 = vrot.slane %v6688_v60, 2  ;;  %8055 = vst [vmem:[#allocation30_spill] sm:$0xff] %v6943_v31  ;;  %v2667_v13 = vsel %vm1193_vm3, %v6949_v1, %v2666_v7  ;;  %v7009_v7 = vld [vmem:[%s6496_s7 + $0x118] sm:$0x3]  ;;  %v7037_v43 = vld [vmem:[%s6496_s7 + $0x130] sm:$0x3] }
  0x51   : > { %8062 = vst [vmem:[#allocation37_spill] sm:$0xff] %v7009_v7  ;;  %8065 = vst [vmem:[#allocation40_spill] sm:$0xff] %v7037_v43 }
  0x53   : > { %5630 = vmatmul.mubr.msk.f32.gmra.mrb[8].mxu0 %vm316_vm1, %v2647_v12  ;;  %5407 = vmatmul.mubr.msk.f32.gmra.mrb[26].mxu1 %vm316_vm1, %v6893_v22  ;;  %v2656_v12 = vrot.slane %v6685_v59, 2 }
  0x54   : > { %5632 = vmatprep.mubr.msk.f32.mxu0 %vm316_vm1, %v6902_v63  ;;  %5409 = vmatprep.mubr.msk.f32.mxu1 %vm316_vm1, %v6905_v21  ;;  %v6931_v63 = vld [vmem:[%s6496_s7 + $0x168] sm:$0xff] }
  0x55   : > { %v2657_v59 = vsel %vm1193_vm3, %v6898_v35, %v2656_v12  ;;  %v1244_v12 = vrot.slane %v6774_v54, 2 }
  0x57   : > { %5633 = vmatmul.mubr.msk.f32.gmra.mrb[10].mxu0 %vm316_vm1, %v2652_v62  ;;  %5410 = vmatmul.mubr.msk.f32.gmra.mrb[28].mxu1 %vm316_vm1, %v6919_v41  ;;  %v1239_v62 = vrot.slane %v6749_v38, 2 }
  0x58   : > { %5635 = vmatprep.mubr.msk.f32.mxu0 %vm316_vm1, %v6928_v5  ;;  %5412 = vmatprep.mubr.msk.f32.mxu1 %vm316_vm1, %v6931_v63  ;;  %v6953_v5 = vsel %vm1193_vm3, %v1234_v37, %v6924_v4  ;;  %v727_v37 = vsel %vm722_vm2, %v724_v51, %v726_v46  ;;  %v6984_v46 = vld [vmem:[%s7947_s1 + $0xc] sm:$0xf]  ;;  %v732_v51 = vsel %vm722_vm2, %v6524_v11, %v731_v29  ;;  %v7012_v11 = vld [vmem:[%s6496_s7 + $0x58] sm:$0x3]  ;;  %v2676_v29 = vrot.slane %v7009_v7, 2 }
  0x59   : > { %8056 = vst [vmem:[#allocation31_spill] sm:$0xff] %v6953_v5  ;;  %v2681_v7 = vrot.slane %v7037_v43, 2 }
  0x5b   : > { %5636 = vmatmul.mubr.msk.f32.gmra.mrb[12].mxu0 %vm316_vm1, %v2657_v59  ;;  %5413 = vmatmul.mubr.msk.f32.gmra.mrb[30].mxu1 %vm316_vm1, %v6943_v31  ;;  %v6972_v59 = vrot.slane %v6790_v57, 2 }
  0x5c   : > { %5638 = vmatprep.mubr.msk.f32.mxu0 %vm316_vm1, %v6953_v5  ;;  %5417 = vmatprep.mubr.msk.f32.mxu1 %vm316_vm1, %v725_v25  ;;  %v6976_v5 = vsel %vm1193_vm3, %v1239_v62, %v6949_v1  ;;  %v6979_v25 = vld [vmem:[%s6496_s7 + $0x100] sm:$0x3]  ;;  %v736_v62 = vrot.slane %v6848_v47, 1 }
  0x5d   : > { %8058 = vst [vmem:[#allocation33_spill] sm:$0xff] %v6972_v59  ;;  %8059 = vst [vmem:[#allocation34_spill] sm:$0xff] %v6979_v25  ;;  %v2671_v33 = vrot.slane %v6979_v25, 2 }
  0x5e   : > { %v737_v47 = vsel %vm722_vm2, %v6545_v18, %v736_v62 }
  0x5f   : > { %5639 = vmatmul.mubr.msk.f32.gmra.mrb[14].mxu0 %vm316_vm1, %v2662_v10  ;;  %5418 = vmatmul.mubr.msk.f32.vlgmr.msra.gmra.mrb[0].mxu1 %vm316_vm1, %v727_v37  ;;  %v1249_v10 = vrot.slane %v6804_v15, 2  ;;  %v7000_v37 = vrot.slane %v6820_v30, 2 }
  0x60   : > { %5466 = vmatpush3.msk.msra.mxu1 %vm413_vm0, %v6518_v9  ;;  %5641 = vmatprep.mubr.msk.f32.mxu0 %vm316_vm1, %v6976_v5  ;;  %v7006_v9 = vsel %vm1193_vm3, %v1244_v12, %v6972_v59  ;;  %v741_v12 = vrot.slane %v7012_v11, 1 }
  0x61   : > { %8060 = vst [vmem:[#allocation35_spill] sm:$0xff] %v7000_v37  ;;  %5420 = vmatprep.mubr.msk.f32.mxu1 %vm316_vm1, %v6542_v17  ;;  %8061 = vst [vmem:[#allocation36_spill] sm:$0xff] %v7006_v9  ;;  %5515 = vmatprep.subr.msk.mxu1 %vm413_vm0, %v6984_v46  ;;  %v2672_v17 = vsel %vm1193_vm3, %v6972_v59, %v2671_v33  ;;  %v7034_v25 = vsel %vm1193_vm3, %v1249_v10, %v7000_v37  ;;  %v7040_v33 = vld [vmem:[%s6496_s7 + $0x70] sm:$0x3] }
  0x62   : > { %8064 = vst [vmem:[#allocation39_spill] sm:$0xff] %v7034_v25  ;;  %v2677_v62 = vsel %vm1193_vm3, %v7000_v37, %v2676_v29  ;;  %v742_v10 = vsel %vm722_vm2, %v6562_v24, %v741_v12  ;;  %v746_v59 = vrot.slane %v7040_v33, 1  ;;  %v7066_v29 = vld [vmem:[%s6496_s7 + $0x88] sm:$0x3] }
  0x63   : > { %5642 = vmatmul.mubr.msk.f32.gmra.mrb[16].mxu0 %vm316_vm1, %v2667_v13  ;;  %5421 = vmatmul.mubr.msk.f32.gmra.mrb[2].mxu1 %vm316_vm1, %v732_v51  ;;  %v1254_v13 = vrot.slane %v6832_v55, 2  ;;  %v7030_v51 = vrot.slane %v6858_v49, 2  ;;  %v751_v37 = vrot.slane %v7066_v29, 1 }
  0x64   : > { %5644 = vmatprep.mubr.msk.f32.mxu0 %vm316_vm1, %v7006_v9  ;;  %5423 = vmatprep.mubr.msk.f32.mxu1 %vm316_vm1, %v6575_v27  ;;  %v7063_v9 = vld [vmem:[%s6496_s7 + $0x148] sm:$0x3] }
  0x65   : > { %8063 = vst [vmem:[#allocation38_spill] sm:$0xff] %v7030_v51  ;;  %8068 = vst [vmem:[#allocation43_spill] sm:$0xff] %v7063_v9  ;;  %v2682_v12 = vsel %vm1193_vm3, %v7030_v51, %v2681_v7  ;;  %v2686_v43 = vrot.slane %v7063_v9, 2  ;;  %v7089_v7 = vld [vmem:[%s6496_s7 + $0x160] sm:$0x3]  ;;  %v752_v9 = vsel %vm722_vm2, %v6628_v42, %v751_v37 }
  0x66   : > { %8071 = vst [vmem:[#allocation46_spill] sm:$0xff] %v7089_v7  ;;  %v7121_v37 = vld [vmem:[%s6496_s7 + $0x180] sm:$0xff] }
  0x67   : > { %5645 = vmatmul.mubr.msk.f32.gmra.mrb[18].mxu0 %vm316_vm1, %v2672_v17  ;;  %5424 = vmatmul.mubr.msk.f32.gmra.mrb[4].mxu1 %vm316_vm1, %v737_v47  ;;  %v1259_v17 = vrot.slane %v6874_v6, 2  ;;  %v7056_v47 = vrot.slane %v6893_v22, 2 }
  0x68   : > { %5647 = vmatprep.mubr.msk.f32.mxu0 %vm316_vm1, %v7034_v25  ;;  %5426 = vmatprep.mubr.msk.f32.mxu1 %vm316_vm1, %v6594_v32  ;;  %v7060_v25 = vsel %vm1193_vm3, %v1254_v13, %v7030_v51  ;;  %v747_v13 = vsel %vm722_vm2, %v6599_v34, %v746_v59  ;;  %v7092_v59 = vld [vmem:[%s6496_s7 + $0xa0] sm:$0x3]  ;;  %v2691_v51 = vrot.slane %v7089_v7, 2  ;;  %v7124_v7 = vld [vmem:[%s6496_s7 + $0x188] sm:$0xff] }
  0x69   : > { %8066 = vst [vmem:[#allocation41_spill] sm:$0xff] %v7056_v47  ;;  %8067 = vst [vmem:[#allocation42_spill] sm:$0xff] %v7060_v25  ;;  %v756_v34 = vrot.slane %v7092_v59, 1 }
  0x6b   : > { %5648 = vmatmul.mubr.msk.f32.gmra.mrb[20].mxu0 %vm316_vm1, %v2677_v62  ;;  %5427 = vmatmul.mubr.msk.f32.gmra.mrb[6].mxu1 %vm316_vm1, %v742_v10  ;;  %v1264_v62 = vrot.slane %v6905_v21, 2  ;;  %v7082_v10 = vrot.slane %v6919_v41, 2 }
  0x6c   : > { %5650 = vmatprep.mubr.msk.f32.mxu0 %vm316_vm1, %v7060_v25  ;;  %5429 = vmatprep.mubr.msk.f32.mxu1 %vm316_vm1, %v6624_v40  ;;  %v7086_v25 = vsel %vm1193_vm3, %v1259_v17, %v7056_v47  ;;  %v2687_v17 = vsel %vm1193_vm3, %v7056_v47, %v2686_v43  ;;  %v7118_v43 = vld [vmem:[%s6496_s7 + $0xb8] sm:$0x3]  ;;  %v757_v47 = vsel %vm722_vm2, %v6655_v50, %v756_v34 }
  0x6d   : > { %8069 = vst [vmem:[#allocation44_spill] sm:$0xff] %v7082_v10  ;;  %8070 = vst [vmem:[#allocation45_spill] sm:$0xff] %v7086_v25  ;;  %v761_v40 = vrot.slane %v7118_v43, 1 }
  0x6f   : > { %5651 = vmatmul.mubr.msk.f32.gmra.mrb[22].mxu0 %vm316_vm1, %v2682_v12  ;;  %5430 = vmatmul.mubr.msk.f32.gmra.mrb[8].mxu1 %vm316_vm1, %v747_v13  ;;  %v1269_v12 = vrot.slane %v6931_v63, 2  ;;  %v7108_v13 = vrot.slane %v6943_v31, 2 }
  0x70   : > { %5653 = vmatprep.mubr.msk.f32.mxu0 %vm316_vm1, %v7086_v25  ;;  %5432 = vmatprep.mubr.msk.f32.mxu1 %vm316_vm1, %v6651_v48  ;;  %v7112_v25 = vsel %vm1193_vm3, %v1264_v62, %v7082_v10  ;;  %v7115_v48 = vld [vmem:[%s6496_s7 + $0x178] sm:$0x3]  ;;  %v2692_v62 = vsel %vm1193_vm3, %v7082_v10, %v2691_v51  ;;  %v7150_v51 = vld [vmem:[%s6496_s7 + $0xd0] sm:$0x3] }
  0x71   : > { %8072 = vst [vmem:[#allocation47_spill] sm:$0xff] %v7108_v13  ;;  %8073 = vst [vmem:[#allocation48_spill] sm:$0xff] %v7112_v25  ;;  %v2696_v42 = vrot.slane %v7115_v48, 2  ;;  %v766_v10 = vrot.slane %v7150_v51, 1 }
  0x72   : > { %8074 = vst [vmem:[#allocation49_spill] sm:$0xff] %v7115_v48 }
  0x73   : > { %5654 = vmatmul.mubr.msk.f32.gmra.mrb[24].mxu0 %vm316_vm1, %v2687_v17  ;;  %5433 = vmatmul.mubr.msk.f32.gmra.mrb[10].mxu1 %vm316_vm1, %v752_v9  ;;  %v7140_v17 = vsel %vm1193_vm3, %v1269_v12, %v7108_v13  ;;  %v2698_v9 = vrot.slane %v7121_v37, 2  ;;  %v2697_v34 = vsel %vm1193_vm3, %v7108_v13, %v2696_v42  ;;  %v762_v12 = vsel %vm722_vm2, %v6682_v58, %v761_v40 }
  0x74   : > { %5656 = vmatprep.mubr.msk.f32.mxu0 %vm316_vm1, %v7112_v25  ;;  %5435 = vmatprep.mubr.msk.f32.mxu1 %vm316_vm1, %v6678_v56  ;;  %8075 = vst [vmem:[#allocation50_spill] sm:$0xff] %v7140_v17  ;;  %v7144_v25 = vrot.slane %v7124_v7, 2  ;;  %v7147_v56 = vld [vmem:[%s6496_s7 + $0x190] sm:$0x3]  ;;  %v767_v42 = vsel %vm722_vm2, %v6709_v3, %v766_v10 }
  0x75   : > { %8077 = vst [vmem:[#allocation52_spill] sm:$0xff] %v7147_v56  ;;  %v2701_v48 = vrot.slane %v7147_v56, 2  ;;  %v773_v56 = vrot.slane %v6774_v54, 1 }
  0x76   : > { %8076 = vst [vmem:[#allocation51_spill] sm:$0xff] %v7144_v25 }
  0x77   : > { %5657 = vmatmul.mubr.msk.f32.gmra.mrb[26].mxu0 %vm316_vm1, %v2692_v62  ;;  %5436 = vmatmul.mubr.msk.f32.gmra.mrb[12].mxu1 %vm316_vm1, %v757_v47  ;;  %v768_v62 = vrot.slane %v6749_v38, 1  ;;  %v7166_v47 = vrot.slane %v6761_v39, 1  ;;  %v2702_v40 = vsel %vm1193_vm3, %v7144_v25, %v2701_v48 }
  0x78   : > { %5659 = vmatprep.mubr.msk.f32.mxu0 %vm316_vm1, %v7140_v17  ;;  %5438 = vmatprep.mubr.msk.f32.mxu1 %vm316_vm1, %v6705_v0  ;;  %v7170_v17 = vsel %vm1193_vm3, %v2698_v9, %v7144_v25  ;;  %v7173_v0 = vld [vmem:[%s6496_s7 + $0xe8] sm:$0x3]  ;;  %v7208_v25 = vrot.slane %v6820_v30, 1 }
  0x79   : > { %8078 = vst [vmem:[#allocation53_spill] sm:$0xff] %v7166_v47  ;;  %8079 = vst [vmem:[#allocation54_spill] sm:$0xff] %v7170_v17  ;;  %v771_v9 = vrot.slane %v7173_v0, 1 }
  0x7a   : > { %8081 = vst [vmem:[#allocation56_spill] sm:$0xff] %v7208_v25 }
  0x7b   : > { %5660 = vmatmul.mubr.msk.f32.gmra.mrb[28].mxu0 %vm316_vm1, %v2697_v34  ;;  %5439 = vmatmul.mubr.msk.f32.gmra.mrb[14].mxu1 %vm316_vm1, %v762_v12  ;;  %v7188_v34 = vrot.slane %v6790_v57, 1  ;;  %v7192_v12 = vsel %vm722_vm2, %v768_v62, %v7166_v47  ;;  %v772_v48 = vsel %vm722_vm2, %v7166_v47, %v771_v9  ;;  %v778_v62 = vrot.slane %v6804_v15, 1  ;;  %v7223_v9 = vld [vmem:[%s7947_s1 + $0x20] sm:$0xf]  ;;  %v7243_v47 = vld [vmem:[%s6496_s7 + $0x130] sm:$0x3] }
  0x7c   : > { %5662 = vmatprep.mubr.msk.f32.mxu0 %vm316_vm1, %v7170_v17  ;;  %5441 = vmatprep.mubr.msk.f32.mxu1 %vm316_vm1, %v6730_v23  ;;  %v7195_v17 = vld [vmem:[%s6496_s7 + $0x100] sm:$0x3] }
  0x7d   : > { %8080 = vst [vmem:[#allocation55_spill] sm:$0xff] %v7188_v34  ;;  %v776_v10 = vrot.slane %v7195_v17, 1 }
  0x7f   : > { %5663 = vmatmul.mubr.msk.f32.gmra.mrb[30].mxu0 %vm316_vm1, %v2702_v40  ;;  %5442 = vmatmul.mubr.msk.f32.gmra.mrb[16].mxu1 %vm316_vm1, %v767_v42  ;;  %v7212_v40 = vsel %vm722_vm2, %v773_v56, %v7188_v34  ;;  %v7215_v42 = vld [vmem:[%s6496_s7 + $0x118] sm:$0x3]  ;;  %v777_v56 = vsel %vm722_vm2, %v7188_v34, %v776_v10  ;;  %v786_v10 = vrot.slane %v7243_v47, 1  ;;  %v7259_v34 = vrot.slane %v6893_v22, 1 }
  0x80   : > { %5667 = vmatprep.mubr.msk.f32.mxu0 %vm316_vm1, %v6513_v8  ;;  %5444 = vmatprep.mubr.msk.f32.mxu1 %vm316_vm1, %v7192_v12  ;;  %v781_v8 = vrot.slane %v7215_v42, 1 }
  0x83   : > { %5668 = vmatmul.mubr.msk.f32.vlgmr.msra.gmra.mrb[0].mxu0 %vm316_vm1, %v6534_v14  ;;  %5445 = vmatmul.mubr.msk.f32.gmra.mrb[18].mxu1 %vm316_vm1, %v772_v48  ;;  %v783_v14 = vrot.slane %v6832_v55, 1  ;;  %v7234_v48 = vrot.slane %v6858_v49, 1 }
  0x84   : > { %5670 = vmatprep.mubr.msk.f32.mxu0 %vm316_vm1, %v6538_v16  ;;  %5447 = vmatprep.mubr.msk.f32.mxu1 %vm316_vm1, %v7212_v40  ;;  %v7240_v16 = vsel %vm722_vm2, %v778_v62, %v7208_v25  ;;  %v788_v62 = vrot.slane %v6874_v6, 1 }
  0x85   : > { %8082 = vst [vmem:[#allocation57_spill] sm:$0xff] %v7234_v48  ;;  %5716 = vmatpush3.msk.msra.mxu0 %vm413_vm0, %v6782_v19  ;;  %v782_v19 = vsel %vm722_vm2, %v7208_v25, %v781_v8  ;;  %v787_v8 = vsel %vm722_vm2, %v7234_v48, %v786_v10  ;;  %v7280_v25 = vrot.slane %v6919_v41, 1 }
  0x86   : > { %5765 = vmatprep.subr.msk.mxu0 %vm413_vm0, %v7223_v9 }
  0x87   : > { %5671 = vmatmul.mubr.msk.f32.gmra.mrb[2].mxu0 %vm316_vm1, %v6551_v20  ;;  %5448 = vmatmul.mubr.msk.f32.gmra.mrb[20].mxu1 %vm316_vm1, %v777_v56  ;;  %v7263_v20 = vsel %vm722_vm2, %v783_v14, %v7234_v48  ;;  %v7266_v56 = vld [vmem:[%s6496_s7 + $0x148] sm:$0x3]  ;;  %v793_v14 = vrot.slane %v6905_v21, 1  ;;  %8084 = vst [vmem:[#allocation59_spill] sm:$0xff] %v7280_v25 }
  0x88   : > { %5673 = vmatprep.mubr.msk.f32.mxu0 %vm316_vm1, %v6568_v26  ;;  %5450 = vmatprep.mubr.msk.f32.mxu1 %vm316_vm1, %v7240_v16  ;;  %8083 = vst [vmem:[#allocation58_spill] sm:$0xff] %v7263_v20  ;;  %v791_v26 = vrot.slane %v7266_v56, 1 }
  0x8a   : > { %v792_v10 = vsel %vm722_vm2, %v7259_v34, %v791_v26 }
  0x8b   : > { %5674 = vmatmul.mubr.msk.f32.gmra.mrb[4].mxu0 %vm316_vm1, %v6578_v28  ;;  %5451 = vmatmul.mubr.msk.f32.gmra.mrb[22].mxu1 %vm316_vm1, %v782_v19  ;;  %v7284_v28 = vsel %vm722_vm2, %v788_v62, %v7259_v34  ;;  %v7287_v19 = vld [vmem:[%s6496_s7 + $0x160] sm:$0x3]  ;;  %v798_v62 = vrot.slane %v6931_v63, 1 }
  0x8c   : > { %5676 = vmatprep.mubr.msk.f32.mxu0 %vm316_vm1, %v6605_v36  ;;  %5453 = vmatprep.mubr.msk.f32.mxu1 %vm316_vm1, %v7263_v20  ;;  %v8085_v36 = vld [vmem:[#allocation8_spill] sm:$0xff]  ;;  %v796_v48 = vrot.slane %v7287_v19, 1  ;;  %v7301_v20 = vrot.slane %v6943_v31, 1 }
  0x8f   : > { %5677 = vmatmul.mubr.msk.f32.gmra.mrb[6].mxu0 %vm316_vm1, %v8085_v36  ;;  %5454 = vmatmul.mubr.msk.f32.gmra.mrb[24].mxu1 %vm316_vm1, %v787_v8  ;;  %v7305_v36 = vsel %vm722_vm2, %v793_v14, %v7280_v25  ;;  %v7308_v8 = vld [vmem:[%s6496_s7 + $0x178] sm:$0x3]  ;;  %v7322_v14 = vsel %vm722_vm2, %v798_v62, %v7301_v20  ;;  %v8093_v62 = vld [vmem:[#allocation18_spill] sm:$0xff] }
  0x90   : > { %5679 = vmatprep.mubr.msk.f32.mxu0 %vm316_vm1, %v6634_v44  ;;  %5456 = vmatprep.mubr.msk.f32.mxu1 %vm316_vm1, %v7284_v28  ;;  %v797_v44 = vsel %vm722_vm2, %v7280_v25, %v796_v48  ;;  %v801_v26 = vrot.slane %v7308_v8, 1  ;;  %8086 = vst [vmem:[#allocation8_spill] sm:$0xff] %v7322_v14  ;;  %v8090_v48 = vld [vmem:[#allocation24_spill] sm:$0xff] }
  0x93   : > { %5680 = vmatmul.mubr.msk.f32.gmra.mrb[8].mxu0 %vm316_vm1, %v6637_v45  ;;  %5457 = vmatmul.mubr.msk.f32.gmra.mrb[26].mxu1 %vm316_vm1, %v792_v10  ;;  %v802_v45 = vsel %vm722_vm2, %v7301_v20, %v801_v26  ;;  %v8092_v10 = vld [vmem:[#allocation25_spill] sm:$0xff] }
  0x94   : > { %5682 = vmatprep.mubr.msk.f32.mxu0 %vm316_vm1, %v6661_v52  ;;  %5459 = vmatprep.mubr.msk.f32.mxu1 %vm316_vm1, %v7305_v36  ;;  %v8087_v52 = vld [vmem:[#allocation21_spill] sm:$0xff] }
  0x97   : > { %5683 = vmatmul.mubr.msk.f32.gmra.mrb[10].mxu0 %vm316_vm1, %v6664_v53  ;;  %5460 = vmatmul.mubr.msk.f32.gmra.mrb[28].mxu1 %vm316_vm1, %v797_v44  ;;  %v8088_v53 = vld [vmem:[#allocation14_spill] sm:$0xff]  ;;  %v8094_v44 = vld [vmem:[#allocation15_spill] sm:$0xff] }
  0x98   : > { %5685 = vmatprep.mubr.msk.f32.mxu0 %vm316_vm1, %v6688_v60  ;;  %5462 = vmatprep.mubr.msk.f32.mxu1 %vm316_vm1, %v7322_v14 }
  0x9b   : > { %5686 = vmatmul.mubr.msk.f32.gmra.mrb[12].mxu0 %vm316_vm1, %v6691_v61  ;;  %5463 = vmatmul.mubr.msk.f32.gmra.mrb[30].mxu1 %vm316_vm1, %v802_v45  ;;  %v8089_v61 = vld [vmem:[#allocation5_spill] sm:$0xff]  ;;  %v1217_v45 = vrot.slane %v7040_v33, 2  ;;  %v8097_v33 = vld [vmem:[#allocation23_spill] sm:$0xff] }
  0x9c   : > { %5688 = vmatprep.mubr.msk.f32.mxu0 %vm316_vm1, %v6749_v38  ;;  %5467 = vmatprep.mubr.msk.f32.mxu1 %vm316_vm1, %v8087_v52  ;;  %v8096_v52 = vld [vmem:[#allocation17_spill] sm:$0xff] }
  0x9f   : > { %5689 = vmatmul.mubr.msk.f32.gmra.mrb[14].mxu0 %vm316_vm1, %v6761_v39  ;;  %5468 = vmatmul.mubr.msk.f32.vlgmr.msra.gmra.mrb[0].mxu1 %vm316_vm1, %v6862_v2  ;;  %v8091_v2 = vld [vmem:[#allocation16_spill] sm:$0xff] }
  0xa0   : > { %5516 = vmatpush3.msk.msra.mxu1 %vm413_vm0, %v6984_v46  ;;  %5691 = vmatprep.mubr.msk.f32.mxu0 %vm316_vm1, %v6774_v54  ;;  %v1212_v46 = vrot.slane %v7012_v11, 2  ;;  %v8095_v11 = vld [vmem:[#allocation20_spill] sm:$0xff] }
  0xa1   : > { %5470 = vmatprep.mubr.msk.f32.mxu1 %vm316_vm1, %v8088_v53  ;;  %5815 = vmatprep.subr.msk.mxu1 %vm413_vm0, %v8089_v61  ;;  %v1218_v53 = vsel %vm1193_vm3, %v8096_v52, %v1217_v45  ;;  %v1222_v61 = vrot.slane %v7066_v29, 2  ;;  %v8099_v29 = vld [vmem:[#allocation27_spill] sm:$0xff]  ;;  %v1232_v45 = vrot.slane %v7118_v43, 2  ;;  %v7416_v43 = vld [vmem:[%s6496_s7 + $0x40] sm:$0x3] }
  0xa2   : > { %v1213_v26 = vsel %vm1193_vm3, %v8094_v44, %v1212_v46  ;;  %v1227_v46 = vrot.slane %v7092_v59, 2  ;;  %v8101_v59 = vld [vmem:[#allocation29_spill] sm:$0xff] }
  0xa3   : > { %5692 = vmatmul.mubr.msk.f32.gmra.mrb[16].mxu0 %vm316_vm1, %v6790_v57  ;;  %5471 = vmatmul.mubr.msk.f32.gmra.mrb[2].mxu1 %vm316_vm1, %v8090_v48  ;;  %v8098_v48 = vld [vmem:[#allocation19_spill] sm:$0xff] }
  0xa4   : > { %5694 = vmatprep.mubr.msk.f32.mxu0 %vm316_vm1, %v6804_v15  ;;  %5473 = vmatprep.mubr.msk.f32.mxu1 %vm316_vm1, %v8091_v2  ;;  %v1223_v2 = vsel %vm1193_vm3, %v8098_v48, %v1222_v61  ;;  %v1237_v61 = vrot.slane %v7150_v51, 2 }
  0xa6   : > { %v1238_v51 = vsel %vm1193_vm3, %v6924_v4, %v1237_v61  ;;  %v1247_v4 = vrot.slane %v7195_v17, 2 }
  0xa7   : > { %5695 = vmatmul.mubr.msk.f32.gmra.mrb[18].mxu0 %vm316_vm1, %v6820_v30  ;;  %5474 = vmatmul.mubr.msk.f32.gmra.mrb[4].mxu1 %vm316_vm1, %v8092_v10  ;;  %v8100_v10 = vld [vmem:[#allocation22_spill] sm:$0xff] }
  0xa8   : > { %5697 = vmatprep.mubr.msk.f32.mxu0 %vm316_vm1, %v6832_v55  ;;  %5476 = vmatprep.mubr.msk.f32.mxu1 %vm316_vm1, %v8093_v62 }
  0xab   : > { %5698 = vmatmul.mubr.msk.f32.gmra.mrb[20].mxu0 %vm316_vm1, %v6858_v49  ;;  %5477 = vmatmul.mubr.msk.f32.gmra.mrb[6].mxu1 %vm316_vm1, %v1213_v26  ;;  %v1228_v26 = vsel %vm1193_vm3, %v8100_v10, %v1227_v46  ;;  %v8102_v46 = vld [vmem:[#allocation31_spill] sm:$0xff] }
  0xac   : > { %5700 = vmatprep.mubr.msk.f32.mxu0 %vm316_vm1, %v6874_v6  ;;  %5479 = vmatprep.mubr.msk.f32.mxu1 %vm316_vm1, %v8095_v11 }
  0xaf   : > { %5701 = vmatmul.mubr.msk.f32.gmra.mrb[22].mxu0 %vm316_vm1, %v6893_v22  ;;  %5480 = vmatmul.mubr.msk.f32.gmra.mrb[8].mxu1 %vm316_vm1, %v1218_v53  ;;  %v1233_v53 = vsel %vm1193_vm3, %v6898_v35, %v1232_v45  ;;  %v3585_v45 = vrot.slane %v7416_v43, 1  ;;  %v7433_v35 = vld [vmem:[%s6496_s7 + $0x58] sm:$0x3] }
  0xb0   : > { %5703 = vmatprep.mubr.msk.f32.mxu0 %vm316_vm1, %v6905_v21  ;;  %5482 = vmatprep.mubr.msk.f32.mxu1 %vm316_vm1, %v8097_v33  ;;  %v3590_v61 = vrot.slane %v7433_v35, 1 }
  0xb3   : > { %5704 = vmatmul.mubr.msk.f32.gmra.mrb[24].mxu0 %vm316_vm1, %v6919_v41  ;;  %5483 = vmatmul.mubr.msk.f32.gmra.mrb[10].mxu1 %vm316_vm1, %v1223_v2  ;;  %v7413_v2 = vld [vmem:[%s6496_s7 + $0x198] sm:$0xff] }
  0xb4   : > { %5706 = vmatprep.mubr.msk.f32.mxu0 %vm316_vm1, %v6931_v63  ;;  %5485 = vmatprep.mubr.msk.f32.mxu1 %vm316_vm1, %v8099_v29 }
  0xb7   : > { %5707 = vmatmul.mubr.msk.f32.gmra.mrb[26].mxu0 %vm316_vm1, %v6943_v31  ;;  %5486 = vmatmul.mubr.msk.f32.gmra.mrb[12].mxu1 %vm316_vm1, %v1228_v26  ;;  %v7426_v26 = vld [vmem:[%s6496_s7 + $0x1a0] sm:$0xff]  ;;  %v1242_v31 = vrot.slane %v7173_v0, 2 }
  0xb8   : > { %5709 = vmatprep.mubr.msk.f32.mxu0 %vm316_vm1, %v7121_v37  ;;  %5488 = vmatprep.mubr.msk.f32.mxu1 %vm316_vm1, %v8101_v59  ;;  %8103 = vst [vmem:[#allocation21_spill] sm:$0xff] %v7426_v26 }
  0xb9   : > { %v1243_v0 = vsel %vm1193_vm3, %v6949_v1, %v1242_v31  ;;  %v8105_v31 = vld [vmem:[#allocation33_spill] sm:$0xff] }
  0xbb   : > { %5710 = vmatmul.mubr.msk.f32.gmra.mrb[28].mxu0 %vm316_vm1, %v7124_v7  ;;  %5489 = vmatmul.mubr.msk.f32.gmra.mrb[14].mxu1 %vm316_vm1, %v1233_v53  ;;  %v3586_v53 = vsel %vm722_vm2, %v6545_v18, %v3585_v45  ;;  %v3591_v18 = vsel %vm722_vm2, %v6562_v24, %v3590_v61  ;;  %v1252_v45 = vrot.slane %v7215_v42, 2  ;;  %v8107_v24 = vld [vmem:[#allocation39_spill] sm:$0xff] }
  0xbc   : > { %5712 = vmatprep.mubr.msk.f32.mxu0 %vm316_vm1, %v7413_v2  ;;  %5491 = vmatprep.mubr.msk.f32.mxu1 %vm316_vm1, %v8102_v46  ;;  %v7449_v46 = vld [vmem:[%s6496_s7 + $0x70] sm:$0x3] }
  0xbd   : > { %v3595_v17 = vrot.slane %v7449_v46, 1  ;;  %v8109_v42 = vld [vmem:[#allocation35_spill] sm:$0xff] }
  0xbe   : > { %v1253_v61 = vsel %vm1193_vm3, %v8109_v42, %v1252_v45 }
  0xbf   : > { %5713 = vmatmul.mubr.msk.f32.gmra.mrb[30].mxu0 %vm316_vm1, %v7426_v26  ;;  %5492 = vmatmul.mubr.msk.f32.gmra.mrb[16].mxu1 %vm316_vm1, %v1238_v51  ;;  %v1248_v51 = vsel %vm1193_vm3, %v8105_v31, %v1247_v4  ;;  %v8108_v4 = vld [vmem:[#allocation7_spill] sm:$0xff]  ;;  %v1257_v31 = vrot.slane %v7243_v47, 2 }
  0xc0   : > { %5717 = vmatprep.mubr.msk.f32.mxu0 %vm316_vm1, %v6575_v27  ;;  %5494 = vmatprep.mubr.msk.f32.mxu1 %vm316_vm1, %v6976_v5  ;;  %v8104_v27 = vld [vmem:[#allocation36_spill] sm:$0xff] }
  0xc3   : > { %5718 = vmatmul.mubr.msk.f32.vlgmr.msra.gmra.mrb[0].mxu0 %vm316_vm1, %v3586_v53  ;;  %5495 = vmatmul.mubr.msk.f32.gmra.mrb[18].mxu1 %vm316_vm1, %v1243_v0  ;;  %v7466_v53 = vld [vmem:[%s6496_s7 + $0x88] sm:$0x3]  ;;  %v3596_v0 = vsel %vm722_vm2, %v8108_v4, %v3595_v17 }
  0xc4   : > { %5720 = vmatprep.mubr.msk.f32.mxu0 %vm316_vm1, %v6594_v32  ;;  %5497 = vmatprep.mubr.msk.f32.mxu1 %vm316_vm1, %v8104_v27  ;;  %v8106_v32 = vld [vmem:[#allocation9_spill] sm:$0xff]  ;;  %v8112_v17 = vld [vmem:[#allocation10_spill] sm:$0xff] }
  0xc5   : > { %5766 = vmatpush3.msk.msra.mxu0 %vm413_vm0, %v7223_v9  ;;  %v3600_v9 = vrot.slane %v7466_v53, 1  ;;  %v8113_v4 = vld [vmem:[#allocation38_spill] sm:$0xff] }
  0xc6   : > { %v1258_v42 = vsel %vm1193_vm3, %v8113_v4, %v1257_v31  ;;  %v1267_v4 = vrot.slane %v7287_v19, 2 }
  0xc7   : > { %5721 = vmatmul.mubr.msk.f32.gmra.mrb[2].mxu0 %vm316_vm1, %v3591_v18  ;;  %5498 = vmatmul.mubr.msk.f32.gmra.mrb[20].mxu1 %vm316_vm1, %v1248_v51  ;;  %v7481_v18 = vld [vmem:[%s6496_s7 + $0xa0] sm:$0x3]  ;;  %v8110_v51 = vld [vmem:[#allocation11_spill] sm:$0xff]  ;;  %v3601_v45 = vsel %vm722_vm2, %v8112_v17, %v3600_v9 }
  0xc8   : > { %5723 = vmatprep.mubr.msk.f32.mxu0 %vm316_vm1, %v8106_v32  ;;  %5500 = vmatprep.mubr.msk.f32.mxu1 %vm316_vm1, %v8107_v24  ;;  %v8111_v32 = vld [vmem:[#allocation42_spill] sm:$0xff]  ;;  %v3605_v47 = vrot.slane %v7481_v18, 1  ;;  %v1262_v24 = vrot.slane %v7266_v56, 2  ;;  %v8116_v9 = vld [vmem:[#allocation41_spill] sm:$0xff] }
  0xca   : > { %v3606_v31 = vsel %vm722_vm2, %v6655_v50, %v3605_v47  ;;  %v1263_v17 = vsel %vm1193_vm3, %v8116_v9, %v1262_v24  ;;  %v8119_v24 = vld [vmem:[#allocation44_spill] sm:$0xff]  ;;  %v7526_v9 = vld [vmem:[%s6496_s7 + $0xe8] sm:$0x3] }
  0xcb   : > { %5724 = vmatmul.mubr.msk.f32.gmra.mrb[4].mxu0 %vm316_vm1, %v3596_v0  ;;  %5501 = vmatmul.mubr.msk.f32.gmra.mrb[22].mxu1 %vm316_vm1, %v1253_v61  ;;  %v7496_v0 = vld [vmem:[%s6496_s7 + $0xb8] sm:$0x3]  ;;  %v1268_v19 = vsel %vm1193_vm3, %v8119_v24, %v1267_v4 }
  0xcc   : > { %5726 = vmatprep.mubr.msk.f32.mxu0 %vm316_vm1, %v8110_v51  ;;  %5503 = vmatprep.mubr.msk.f32.mxu1 %vm316_vm1, %v8111_v32  ;;  %v8114_v61 = vld [vmem:[#allocation12_spill] sm:$0xff]  ;;  %v8115_v51 = vld [vmem:[#allocation45_spill] sm:$0xff]  ;;  %v3610_v56 = vrot.slane %v7496_v0, 1 }
  0xce   : > { %v3611_v50 = vsel %vm722_vm2, %v6682_v58, %v3610_v56  ;;  %v8120_v58 = vld [vmem:[#allocation50_spill] sm:$0xff]  ;;  %v7540_v56 = vld [vmem:[%s6496_s7 + $0x100] sm:$0x3] }
  0xcf   : > { %5727 = vmatmul.mubr.msk.f32.gmra.mrb[6].mxu0 %vm316_vm1, %v3601_v45  ;;  %5504 = vmatmul.mubr.msk.f32.gmra.mrb[24].mxu1 %vm316_vm1, %v1258_v42  ;;  %v7511_v45 = vld [vmem:[%s6496_s7 + $0xd0] sm:$0x3]  ;;  %v8117_v42 = vld [vmem:[#allocation13_spill] sm:$0xff] }
  0xd0   : > { %5729 = vmatprep.mubr.msk.f32.mxu0 %vm316_vm1, %v8114_v61  ;;  %5506 = vmatprep.mubr.msk.f32.mxu1 %vm316_vm1, %v8115_v51  ;;  %v8118_v61 = vld [vmem:[#allocation48_spill] sm:$0xff]  ;;  %v3615_v47 = vrot.slane %v7511_v45, 1 }
  0xd2   : > { %v3616_v4 = vsel %vm722_vm2, %v6709_v3, %v3615_v47  ;;  %v8121_v3 = vld [vmem:[#allocation53_spill] sm:$0xff] }
  0xd3   : > { %5730 = vmatmul.mubr.msk.f32.gmra.mrb[8].mxu0 %vm316_vm1, %v3606_v31  ;;  %5507 = vmatmul.mubr.msk.f32.gmra.mrb[26].mxu1 %vm316_vm1, %v1263_v17  ;;  %v1272_v31 = vrot.slane %v7308_v8, 2  ;;  %v3620_v17 = vrot.slane %v7526_v9, 1  ;;  %v6293_v47 = vld [vmem:[%s6496_s7 + $0x20] sm:$0xff] }
  0xd4   : > { %5732 = vmatprep.mubr.msk.f32.mxu0 %vm316_vm1, %v8117_v42  ;;  %5509 = vmatprep.mubr.msk.f32.mxu1 %vm316_vm1, %v8118_v61 }
  0xd5   : > { %v1273_v8 = vsel %vm1193_vm3, %v7108_v13, %v1272_v31  ;;  %v3621_v42 = vsel %vm722_vm2, %v8121_v3, %v3620_v17  ;;  %v8122_v31 = vld [vmem:[#allocation55_spill] sm:$0xff]  ;;  %v7573_v3 = vld [vmem:[%s6496_s7 + $0x38] sm:$0xff] }
  0xd6   : > { %v6295_v17 = vld [vmem:[%s6496_s7 + $0x30] sm:$0xff] }
  0xd7   : > { %5733 = vmatmul.mubr.msk.f32.gmra.mrb[10].mxu0 %vm316_vm1, %v3611_v50  ;;  %5510 = vmatmul.mubr.msk.f32.gmra.mrb[28].mxu1 %vm316_vm1, %v1268_v19  ;;  %v3625_v50 = vrot.slane %v7540_v56, 1  ;;  %v7552_v19 = vld [vmem:[%s6496_s7 + $0x118] sm:$0x3]  ;;  %v7628_v13 = vld [vmem:[%s6496_s7 + $0x190] sm:$0x3] }
  0xd8   : > { %5735 = vmatprep.mubr.msk.f32.mxu0 %vm316_vm1, %v6730_v23  ;;  %5512 = vmatprep.mubr.msk.f32.mxu1 %vm316_vm1, %v8120_v58  ;;  %v6292_v23 = vld [vmem:[%s6496_s7 + $0x18] sm:$0xff]  ;;  %v3655_v58 = vrot.slane %v7628_v13, 1 }
  0xdb   : > { %5736 = vmatmul.mubr.msk.f32.gmra.mrb[12].mxu0 %vm316_vm1, %v3616_v4  ;;  %5513 = vmatmul.mubr.msk.f32.gmra.mrb[30].mxu1 %vm316_vm1, %v1273_v8  ;;  %v3626_v4 = vsel %vm722_vm2, %v8122_v31, %v3625_v50  ;;  %v3630_v8 = vrot.slane %v7552_v19, 1  ;;  %v6298_v31 = vld [vmem:[%s6496_s7 + $0x50] sm:$0xff] }
  0xdc   : > { %5738 = vmatprep.mubr.msk.f32.mxu0 %vm316_vm1, %v7192_v12  ;;  %5517 = vmatprep.mubr.msk.f32.mxu1 %vm316_vm1, %v6292_v23  ;;  %v6294_v12 = vld [vmem:[%s7947_s1 + $0x10] sm:$0xf] }
  0xdd   : > { %v7569_v23 = vld [vmem:[%s6496_s7 + $0x130] sm:$0x3] }
  0xdf   : > { %5739 = vmatmul.mubr.msk.f32.gmra.mrb[14].mxu0 %vm316_vm1, %v3621_v42  ;;  %5518 = vmatmul.mubr.msk.f32.vlgmr.msra.gmra.mrb[0].mxu1 %vm316_vm1, %v6293_v47  ;;  %v8123_v42 = vld [vmem:[#allocation56_spill] sm:$0xff]  ;;  %v3635_v47 = vrot.slane %v7569_v23, 1 }
  0xe0   : > { %5816 = vmatpush3.msk.msra.mxu1 %vm413_vm0, %v6294_v12  ;;  %5741 = vmatprep.mubr.msk.f32.mxu0 %vm316_vm1, %v7212_v40  ;;  %v6297_v40 = vld [vmem:[%s6496_s7 + $0x48] sm:$0xff]  ;;  %v3631_v50 = vsel %vm722_vm2, %v8123_v42, %v3630_v8  ;;  %v7598_v42 = vld [vmem:[%s6496_s7 + $0x160] sm:$0x3] }
  0xe1   : > { %5520 = vmatprep.mubr.msk.f32.mxu1 %vm316_vm1, %v6295_v17  ;;  %v7585_v12 = vld [vmem:[%s6496_s7 + $0x148] sm:$0x3]  ;;  %v8125_v17 = vld [vmem:[#allocation57_spill] sm:$0xff] }
  0xe2   : > { %v3636_v8 = vsel %vm722_vm2, %v8125_v17, %v3635_v47 }
  0xe3   : > { %5742 = vmatmul.mubr.msk.f32.gmra.mrb[16].mxu0 %vm316_vm1, %v3626_v4  ;;  %5521 = vmatmul.mubr.msk.f32.gmra.mrb[2].mxu1 %vm316_vm1, %v7573_v3  ;;  %v8124_v4 = vld [vmem:[#allocation58_spill] sm:$0xff] }
  0xe4   : > { %5744 = vmatprep.mubr.msk.f32.mxu0 %vm316_vm1, %v7240_v16  ;;  %5523 = vmatprep.mubr.msk.f32.mxu1 %vm316_vm1, %v6297_v40  ;;  %v6299_v16 = vld [vmem:[%s6496_s7 + $0x60] sm:$0xff]  ;;  %v3640_v40 = vrot.slane %v7585_v12, 1 }
  0xe6   : > { %v3641_v47 = vsel %vm722_vm2, %v7259_v34, %v3640_v40 }
  0xe7   : > { %5745 = vmatmul.mubr.msk.f32.gmra.mrb[18].mxu0 %vm316_vm1, %v3631_v50  ;;  %5524 = vmatmul.mubr.msk.f32.gmra.mrb[4].mxu1 %vm316_vm1, %v6298_v31  ;;  %v6300_v50 = vld [vmem:[%s6496_s7 + $0x68] sm:$0xff]  ;;  %v6301_v31 = vld [vmem:[%s6496_s7 + $0x78] sm:$0xff] }
  0xe8   : > { %5747 = vmatprep.mubr.msk.f32.mxu0 %vm316_vm1, %v8124_v4  ;;  %5526 = vmatprep.mubr.msk.f32.mxu1 %vm316_vm1, %v6299_v16  ;;  %v3645_v4 = vrot.slane %v7598_v42, 1  ;;  %v7611_v16 = vld [vmem:[%s6496_s7 + $0x178] sm:$0x3] }
  0xe9   : > { %8126 = vst [vmem:[#allocation14_spill] sm:$0xff] %v7611_v16  ;;  %v3650_v40 = vrot.slane %v7611_v16, 1  ;;  %v3657_v16 = vrot.slane %v7413_v2, 1 }
  0xeb   : > { %5748 = vmatmul.mubr.msk.f32.gmra.mrb[20].mxu0 %vm316_vm1, %v3636_v8  ;;  %5527 = vmatmul.mubr.msk.f32.gmra.mrb[6].mxu1 %vm316_vm1, %v6300_v50  ;;  %v6302_v8 = vld [vmem:[%s6496_s7 + $0x80] sm:$0xff]  ;;  %v3646_v50 = vsel %vm722_vm2, %v7280_v25, %v3645_v4  ;;  %v6305_v4 = vld [vmem:[%s6496_s7 + $0xa8] sm:$0xff]  ;;  %v3658_v25 = vrot.slane %v7426_v26, 1  ;;  %v4053_v26 = vrot.slane %v7573_v3, 2 }
  0xec   : > { %5750 = vmatprep.mubr.msk.f32.mxu0 %vm316_vm1, %v7284_v28  ;;  %5529 = vmatprep.mubr.msk.f32.mxu1 %vm316_vm1, %v6301_v31  ;;  %v6303_v28 = vld [vmem:[%s6496_s7 + $0x90] sm:$0xff]  ;;  %v3652_v31 = vrot.slane %v7121_v37, 1 }
  0xef   : > { %5751 = vmatmul.mubr.msk.f32.gmra.mrb[22].mxu0 %vm316_vm1, %v3641_v47  ;;  %5530 = vmatmul.mubr.msk.f32.gmra.mrb[8].mxu1 %vm316_vm1, %v6302_v8  ;;  %v7625_v47 = vrot.slane %v7124_v7, 1  ;;  %v6304_v8 = vld [vmem:[%s6496_s7 + $0x98] sm:$0xff] }
  0xf0   : > { %5753 = vmatprep.mubr.msk.f32.mxu0 %vm316_vm1, %v7305_v36  ;;  %5532 = vmatprep.mubr.msk.f32.mxu1 %vm316_vm1, %v6303_v28  ;;  %v3651_v28 = vsel %vm722_vm2, %v7301_v20, %v3650_v40 }
  0xf1   : > { %v3656_v40 = vsel %vm722_vm2, %v7625_v47, %v3655_v58  ;;  %v8128_v58 = vld [vmem:[#allocation6_spill] sm:$0xff] }
  0xf3   : > { %5754 = vmatmul.mubr.msk.f32.gmra.mrb[24].mxu0 %vm316_vm1, %v3646_v50  ;;  %5533 = vmatmul.mubr.msk.f32.gmra.mrb[10].mxu1 %vm316_vm1, %v6304_v8  ;;  %v7644_v50 = vsel %vm722_vm2, %v3652_v31, %v7625_v47  ;;  %v7647_v8 = vld [vmem:[%s6496_s7 + $0x1a8] sm:$0x3]  ;;  %v3659_v31 = vsel %vm722_vm2, %v3657_v16, %v3658_v25 }
  0xf4   : > { %5756 = vmatprep.mubr.msk.f32.mxu0 %vm316_vm1, %v7322_v14  ;;  %5535 = vmatprep.mubr.msk.f32.mxu1 %vm316_vm1, %v6305_v4  ;;  %8127 = vst [vmem:[#allocation5_spill] sm:$0xff] %v7647_v8  ;;  %v6306_v14 = vld [vmem:[%s6496_s7 + $0xb0] sm:$0xff]  ;;  %v3660_v4 = vrot.slane %v7647_v8, 1  ;;  %v8129_v8 = vrot.slane %v8128_v58, 2 }
  0xf6   : > { %v4054_v16 = vsel %vm1193_vm3, %v8129_v8, %v4053_v26 }
  0xf7   : > { %5757 = vmatmul.mubr.msk.f32.gmra.mrb[26].mxu0 %vm316_vm1, %v3651_v28  ;;  %5536 = vmatmul.mubr.msk.f32.gmra.mrb[12].mxu1 %vm316_vm1, %v6306_v14  ;;  %v6307_v28 = vld [vmem:[%s6496_s7 + $0xc8] sm:$0xff]  ;;  %v4055_v14 = vrot.slane %v7416_v43, 2 }
  0xf8   : > { %5759 = vmatprep.mubr.msk.f32.mxu0 %vm316_vm1, %v7644_v50  ;;  %5538 = vmatprep.mubr.msk.f32.mxu1 %vm316_vm1, %v6688_v60  ;;  %v3661_v60 = vsel %vm722_vm2, %v3658_v25, %v3660_v4  ;;  %v4060_v25 = vrot.slane %v7433_v35, 2 }
  0xfb   : > { %5760 = vmatmul.mubr.msk.f32.gmra.mrb[28].mxu0 %vm316_vm1, %v3656_v40  ;;  %5539 = vmatmul.mubr.msk.f32.gmra.mrb[14].mxu1 %vm316_vm1, %v6307_v28  ;;  %v6312_v40 = vld [vmem:[%s6496_s7 + $0x108] sm:$0xff]  ;;  %v4100_v28 = vrot.slane %v7552_v19, 2 }
  0xfc   : > { %5762 = vmatprep.mubr.msk.f32.mxu0 %vm316_vm1, %v3659_v31  ;;  %5541 = vmatprep.mubr.msk.f32.mxu1 %vm316_vm1, %v6749_v38  ;;  %v4056_v38 = vsel %vm1193_vm3, %v4053_v26, %v4055_v14  ;;  %v2203_v4 = vrot.slane %v6312_v40, 1 }
  0xff   : > { %5763 = vmatmul.mubr.msk.f32.gmra.mrb[30].mxu0 %vm316_vm1, %v3661_v60  ;;  %5542 = vmatmul.mubr.msk.f32.gmra.mrb[16].mxu1 %vm316_vm1, %v6761_v39  ;;  %v4061_v39 = vsel %vm1193_vm3, %v8094_v44, %v4060_v25  ;;  %v8137_v60 = vld [vmem:[#allocation37_spill] sm:$0xff]  ;;  %v8139_v25 = vld [vmem:[#allocation35_spill] sm:$0xff] }
 0x100   : > { %5767 = vmatprep.mubr.msk.f32.mxu0 %vm316_vm1, %v4054_v16  ;;  %5544 = vmatprep.mubr.msk.f32.mxu1 %vm316_vm1, %v6774_v54  ;;  %v4065_v54 = vrot.slane %v7449_v46, 2  ;;  %v6310_v46 = vld [vmem:[%s6496_s7 + $0xf0] sm:$0xff]  ;;  %v2206_v14 = vrot.slane %v8137_v60, 1  ;;  %v6314_v16 = vld [vmem:[%s6496_s7 + $0x120] sm:$0xff] }
 0x101   : > { %v2198_v26 = vrot.slane %v6310_v46, 1  ;;  %v8151_v46 = vld [vmem:[#allocation52_spill] sm:$0xff] }
 0x103   : > { %5768 = vmatmul.mubr.msk.f32.vlgmr.msra.gmra.mrb[0].mxu0 %vm316_vm1, %v4056_v38  ;;  %5545 = vmatmul.mubr.msk.f32.gmra.mrb[18].mxu1 %vm316_vm1, %v6790_v57  ;;  %v4066_v57 = vsel %vm1193_vm3, %v8096_v52, %v4065_v54  ;;  %v2208_v38 = vrot.slane %v6314_v16, 1  ;;  %v4105_v54 = vrot.slane %v7569_v23, 2 }
 0x104   : > { %5770 = vmatprep.mubr.msk.f32.mxu0 %vm316_vm1, %v8093_v62  ;;  %5547 = vmatprep.mubr.msk.f32.mxu1 %vm316_vm1, %v6804_v15  ;;  %v4070_v15 = vrot.slane %v7466_v53, 2  ;;  %v6308_v62 = vld [vmem:[%s6496_s7 + $0xd8] sm:$0xff] }
 0x105   : > { %v2193_v44 = vrot.slane %v6308_v62, 1  ;;  %v6311_v53 = vld [vmem:[%s6496_s7 + $0xf8] sm:$0xff] }
 0x107   : > { %5771 = vmatmul.mubr.msk.f32.gmra.mrb[2].mxu0 %vm316_vm1, %v4061_v39  ;;  %5548 = vmatmul.mubr.msk.f32.gmra.mrb[20].mxu1 %vm316_vm1, %v6820_v30  ;;  %v4071_v30 = vsel %vm1193_vm3, %v8098_v48, %v4070_v15  ;;  %v4101_v39 = vsel %vm1193_vm3, %v8139_v25, %v4100_v28 }
 0x108   : > { %5773 = vmatprep.mubr.msk.f32.mxu0 %vm316_vm1, %v8095_v11  ;;  %5550 = vmatprep.mubr.msk.f32.mxu1 %vm316_vm1, %v6832_v55  ;;  %v4075_v55 = vrot.slane %v7481_v18, 2  ;;  %v6309_v11 = vld [vmem:[%s6496_s7 + $0xe0] sm:$0xff]  ;;  %v2199_v18 = vrot.slane %v6311_v53, 1  ;;  %v4127_v53 = vrot.slane %v7413_v2, 2 }
 0x109   : > { %v2194_v52 = vrot.slane %v6309_v11, 1 }
 0x10a   : > { %v2200_v8 = vsel %vm722_vm2, %v2198_v26, %v2199_v18  ;;  %v2231_v26 = vrot.slane %v8151_v46, 1 }
 0x10b   : > { %5774 = vmatmul.mubr.msk.f32.gmra.mrb[4].mxu0 %vm316_vm1, %v4066_v57  ;;  %5551 = vmatmul.mubr.msk.f32.gmra.mrb[22].mxu1 %vm316_vm1, %v6858_v49  ;;  %v4076_v49 = vsel %vm1193_vm3, %v8100_v10, %v4075_v55  ;;  %v2195_v43 = vsel %vm722_vm2, %v2193_v44, %v2194_v52  ;;  %v8140_v57 = vld [vmem:[#allocation40_spill] sm:$0xff] }
 0x10c   : > { %5776 = vmatprep.mubr.msk.f32.mxu0 %vm316_vm1, %v8097_v33  ;;  %5553 = vmatprep.mubr.msk.f32.mxu1 %vm316_vm1, %v6874_v6  ;;  %v4080_v6 = vrot.slane %v7496_v0, 2  ;;  %v8132_v33 = vld [vmem:[#allocation32_spill] sm:$0xff]  ;;  %v2211_v15 = vrot.slane %v8140_v57, 1 }
 0x10d   : > { %v2196_v48 = vrot.slane %v8132_v33, 1  ;;  %v6315_v55 = vld [vmem:[%s6496_s7 + $0x138] sm:$0xff]  ;;  %v8145_v33 = vld [vmem:[#allocation59_spill] sm:$0xff] }
 0x10e   : > { %v2212_v23 = vsel %vm722_vm2, %v8125_v17, %v2211_v15 }
 0x10f   : > { %5777 = vmatmul.mubr.msk.f32.gmra.mrb[6].mxu0 %vm316_vm1, %v4071_v30  ;;  %5554 = vmatmul.mubr.msk.f32.gmra.mrb[24].mxu1 %vm316_vm1, %v6893_v22  ;;  %v8130_v22 = vld [vmem:[#allocation26_spill] sm:$0xff]  ;;  %v2197_v0 = vsel %vm722_vm2, %v2194_v52, %v2196_v48  ;;  %v2210_v30 = vsel %vm722_vm2, %v2208_v38, %v8125_v17  ;;  %v4115_v17 = vrot.slane %v7598_v42, 2 }
 0x110   : > { %5779 = vmatprep.mubr.msk.f32.mxu0 %vm316_vm1, %v8099_v29  ;;  %5556 = vmatprep.mubr.msk.f32.mxu1 %vm316_vm1, %v6905_v21  ;;  %v4081_v35 = vsel %vm1193_vm3, %v8130_v22, %v4080_v6  ;;  %v4085_v21 = vrot.slane %v7511_v45, 2  ;;  %v8133_v29 = vld [vmem:[#allocation31_spill] sm:$0xff]  ;;  %v8135_v45 = vld [vmem:[#allocation34_spill] sm:$0xff] }
 0x111   : > { %v2201_v3 = vrot.slane %v8135_v45, 1  ;;  %v8141_v6 = vld [vmem:[#allocation38_spill] sm:$0xff]  ;;  %v8155_v45 = vld [vmem:[#allocation5_spill] sm:$0xff] }
 0x112   : > { %v4106_v22 = vsel %vm1193_vm3, %v8141_v6, %v4105_v54  ;;  %v8144_v52 = vld [vmem:[#allocation46_spill] sm:$0xff]  ;;  %v4130_v2 = vrot.slane %v8155_v45, 2 }
 0x113   : > { %5780 = vmatmul.mubr.msk.f32.gmra.mrb[8].mxu0 %vm316_vm1, %v4076_v49  ;;  %5557 = vmatmul.mubr.msk.f32.gmra.mrb[26].mxu1 %vm316_vm1, %v6919_v41  ;;  %v8131_v41 = vld [vmem:[#allocation30_spill] sm:$0xff]  ;;  %v2213_v49 = vrot.slane %v6315_v55, 1 }
 0x114   : > { %5782 = vmatprep.mubr.msk.f32.mxu0 %vm316_vm1, %v8101_v59  ;;  %5559 = vmatprep.mubr.msk.f32.mxu1 %vm316_vm1, %v6931_v63  ;;  %v8134_v63 = vld [vmem:[#allocation28_spill] sm:$0xff]  ;;  %v4090_v59 = vrot.slane %v7526_v9, 2  ;;  %v4095_v9 = vrot.slane %v7540_v56, 2  ;;  %v2202_v56 = vsel %vm722_vm2, %v2199_v18, %v2201_v3  ;;  %v8146_v48 = vld [vmem:[#allocation14_spill] sm:$0xff]  ;;  %v8152_v18 = vld [vmem:[#allocation21_spill] sm:$0xff] }
 0x115   : > { %v4086_v10 = vsel %vm1193_vm3, %v8134_v63, %v4085_v21  ;;  %v8142_v21 = vld [vmem:[#allocation43_spill] sm:$0xff]  ;;  %v2215_v44 = vsel %vm722_vm2, %v2213_v49, %v7259_v34  ;;  %v4120_v42 = vrot.slane %v8146_v48, 2 }
 0x116   : > { %v2216_v62 = vrot.slane %v8142_v21, 1 }
 0x117   : > { %5783 = vmatmul.mubr.msk.f32.gmra.mrb[10].mxu0 %vm316_vm1, %v4081_v35  ;;  %5560 = vmatmul.mubr.msk.f32.gmra.mrb[28].mxu1 %vm316_vm1, %v8131_v41  ;;  %v4110_v35 = vrot.slane %v7585_v12, 2  ;;  %v2221_v41 = vrot.slane %v8144_v52, 1 }
 0x118   : > { %5785 = vmatprep.mubr.msk.f32.mxu0 %vm316_vm1, %v8133_v29  ;;  %5562 = vmatprep.mubr.msk.f32.mxu1 %vm316_vm1, %v7121_v37  ;;  %v4091_v37 = vsel %vm1193_vm3, %v6949_v1, %v4090_v59  ;;  %v8136_v1 = vld [vmem:[#allocation33_spill] sm:$0xff]  ;;  %v2217_v12 = vsel %vm722_vm2, %v7259_v34, %v2216_v62 }
 0x119   : > { %v2222_v34 = vsel %vm722_vm2, %v8145_v33, %v2221_v41  ;;  %v8147_v29 = vld [vmem:[#allocation49_spill] sm:$0xff] }
 0x11a   : > { %v2226_v63 = vrot.slane %v8147_v29, 1 }
 0x11b   : > { %5786 = vmatmul.mubr.msk.f32.gmra.mrb[12].mxu0 %vm316_vm1, %v4086_v10  ;;  %5563 = vmatmul.mubr.msk.f32.gmra.mrb[30].mxu1 %vm316_vm1, %v7124_v7  ;;  %v6313_v7 = vld [vmem:[%s6496_s7 + $0x110] sm:$0xff]  ;;  %v8148_v10 = vld [vmem:[#allocation50_spill] sm:$0xff] }
 0x11c   : > { %5788 = vmatprep.mubr.msk.f32.mxu0 %vm316_vm1, %v6976_v5  ;;  %5591 = vmatprep.mubr.msk.f32.mxu1 %vm316_vm1, %v2195_v43  ;;  %v2204_v31 = vrot.slane %v6313_v7, 1  ;;  %v4096_v5 = vsel %vm1193_vm3, %v8136_v1, %v4095_v9  ;;  %v2227_v59 = vsel %vm722_vm2, %v7301_v20, %v2226_v63  ;;  %v4125_v43 = vrot.slane %v7628_v13, 2  ;;  %v8154_v9 = vld [vmem:[#allocation51_spill] sm:$0xff] }
 0x11d   : > { %v2232_v13 = vsel %vm722_vm2, %v7625_v47, %v2231_v26 }
 0x11e   : > { %v2205_v58 = vsel %vm722_vm2, %v2203_v4, %v2204_v31  ;;  %v2207_v19 = vsel %vm722_vm2, %v2204_v31, %v2206_v14  ;;  %v4126_v20 = vsel %vm1193_vm3, %v8154_v9, %v4125_v43 }
 0x11f   : > { %5789 = vmatmul.mubr.msk.f32.gmra.mrb[14].mxu0 %vm316_vm1, %v4091_v37  ;;  %5592 = vmatmul.mubr.msk.f32.vlgmr.msra.gmra.mrb[16].mxu1 %vm316_vm1, %v2197_v0  ;;  %v4128_v37 = vrot.slane %v8152_v18, 2  ;;  %v8153_v0 = vld [vmem:[#allocation54_spill] sm:$0xff] }
 0x120   : > { %5791 = vmatprep.mubr.msk.f32.mxu0 %vm316_vm1, %v8104_v27  ;;  %5594 = vmatprep.mubr.msk.f32.mxu1 %vm316_vm1, %v2200_v8  ;;  %v8138_v27 = vld [vmem:[#allocation39_spill] sm:$0xff] }
 0x121   : > { %v4129_v3 = vsel %vm1193_vm3, %v4127_v53, %v4128_v37  ;;  %v4131_v8 = vsel %vm1193_vm3, %v4128_v37, %v4130_v2 }
 0x123   : > { %5792 = vmatmul.mubr.msk.f32.gmra.mrb[16].mxu0 %vm316_vm1, %v4096_v5  ;;  %5595 = vmatmul.mubr.msk.f32.gmra.mrb[18].mxu1 %vm316_vm1, %v2202_v56 }
 0x124   : > { %5794 = vmatprep.mubr.msk.f32.mxu0 %vm316_vm1, %v8138_v27  ;;  %5597 = vmatprep.mubr.msk.f32.mxu1 %vm316_vm1, %v2205_v58 }
 0x127   : > { %5795 = vmatmul.mubr.msk.f32.gmra.mrb[18].mxu0 %vm316_vm1, %v4101_v39  ;;  %5598 = vmatmul.mubr.msk.f32.gmra.mrb[20].mxu1 %vm316_vm1, %v2207_v19 }
 0x128   : > { %5797 = vmatprep.mubr.msk.f32.mxu0 %vm316_vm1, %v8111_v32  ;;  %5600 = vmatprep.mubr.msk.f32.mxu1 %vm316_vm1, %v2210_v30  ;;  %v8143_v32 = vld [vmem:[#allocation41_spill] sm:$0xff] }
 0x129   : > { %v4111_v11 = vsel %vm1193_vm3, %v8143_v32, %v4110_v35 }
 0x12b   : > { %5798 = vmatmul.mubr.msk.f32.gmra.mrb[20].mxu0 %vm316_vm1, %v4106_v22  ;;  %5601 = vmatmul.mubr.msk.f32.gmra.mrb[22].mxu1 %vm316_vm1, %v2212_v23 }
 0x12c   : > { %5800 = vmatprep.mubr.msk.f32.mxu0 %vm316_vm1, %v8115_v51  ;;  %5603 = vmatprep.mubr.msk.f32.mxu1 %vm316_vm1, %v2215_v44  ;;  %v4116_v51 = vsel %vm1193_vm3, %v8119_v24, %v4115_v17 }
 0x12f   : > { %5801 = vmatmul.mubr.msk.f32.gmra.mrb[22].mxu0 %vm316_vm1, %v4111_v11  ;;  %5604 = vmatmul.mubr.msk.f32.gmra.mrb[24].mxu1 %vm316_vm1, %v2217_v12 }
 0x130   : > { %5803 = vmatprep.mubr.msk.f32.mxu0 %vm316_vm1, %v8118_v61  ;;  %5606 = vmatprep.mubr.msk.f32.mxu1 %vm316_vm1, %v7305_v36  ;;  %v8149_v61 = vld [vmem:[#allocation8_spill] sm:$0xff]  ;;  %v8150_v36 = vld [vmem:[#allocation47_spill] sm:$0xff] }
 0x131   : > { %v4121_v24 = vsel %vm1193_vm3, %v8150_v36, %v4120_v42 }
 0x133   : > { %5804 = vmatmul.mubr.msk.f32.gmra.mrb[24].mxu0 %vm316_vm1, %v4116_v51  ;;  %5607 = vmatmul.mubr.msk.f32.gmra.mrb[26].mxu1 %vm316_vm1, %v2222_v34 }
 0x134   : > { %5806 = vmatprep.mubr.msk.f32.mxu0 %vm316_vm1, %v8148_v10  ;;  %5609 = vmatprep.mubr.msk.f32.mxu1 %vm316_vm1, %v8149_v61 }
 0x137   : > { %5807 = vmatmul.mubr.msk.f32.gmra.mrb[26].mxu0 %vm316_vm1, %v4121_v24  ;;  %5610 = vmatmul.mubr.msk.f32.gmra.mrb[28].mxu1 %vm316_vm1, %v2227_v59 }
 0x138   : > { %5809 = vmatprep.mubr.msk.f32.mxu0 %vm316_vm1, %v8153_v0  ;;  %5612 = vmatprep.mubr.msk.f32.mxu1 %vm316_vm1, %v7644_v50 }
 0x13b   : > { %5810 = vmatmul.mubr.msk.f32.gmra.mrb[28].mxu0 %vm316_vm1, %v4126_v20  ;;  %5613 = vmatmul.mubr.msk.f32.gmra.mrb[30].mxu1 %vm316_vm1, %v2232_v13 }
 0x13c   : > { %5812 = vmatprep.mubr.msk.f32.mxu0 %vm316_vm1, %v4129_v3 }
 0x13f   : > { %5813 = vmatmul.mubr.msk.f32.gmra.mrb[30].mxu0 %vm316_vm1, %v4131_v8 }
 0x1b2   : > { %v5519_v50 = vpop.f32.mrb[0].mxu1 }
 0x1b3   : > { %v1914_v40 = vpop.f32.mrb[1].mxu1 }
 0x1b6   : > { %v5522_v4 = vpop.f32.mrb[2].mxu1 }
 0x1b7   : > { %v1924_v47 = vpop.f32.mrb[3].mxu1 }
 0x1ba   : > { %v5525_v7 = vpop.f32.mrb[4].mxu1 }
 0x1bb   : > { %v1934_v31 = vpop.f32.mrb[5].mxu1 }
 0x1be   : > { %v5528_v1 = vpop.f32.mrb[6].mxu1 }
 0x1bf   : > { %v1944_v5 = vpop.f32.mrb[7].mxu1 }
 0x1c2   : > { %v5531_v56 = vpop.f32.mrb[8].mxu1 }
 0x1c3   : > { %v1954_v28 = vpop.f32.mrb[9].mxu1 }
 0x1c6   : > { %v5534_v60 = vpop.f32.mrb[10].mxu1 }
 0x1c7   : > { %v1964_v14 = vpop.f32.mrb[11].mxu1 }
 0x1ca   : > { %v5537_v58 = vpop.f32.mrb[12].mxu1 }
 0x1cb   : > { %v1974_v16 = vpop.f32.mrb[13].mxu1 }
 0x1ce   : > { %v5540_v38 = vpop.f32.mrb[14].mxu1 }
 0x1cf   : > { %v1984_v27 = vpop.f32.mrb[15].mxu1 }
 0x1d6   : > { %v5769_v25 = vpop.f32.mrb[0].mxu0 }
 0x1d7   : > { %v5822_v39 = vadd.f32 %v5769_v25, %v5519_v50  ;;  %v4299_v19 = vpop.f32.mrb[1].mxu0 }
 0x1d8   : > { %v5828_v54 = vadd.f32 %v4299_v19, %v1914_v40 }
 0x1d9   : > { %4491 = vst [vmem:[%s7855_s4 + $0x8] sm:$0xff] %v5822_v39 }
 0x1da   : > { %4490 = vst [vmem:[%s7855_s4] sm:$0xff] %v5828_v54  ;;  %v5772_v57 = vpop.f32.mrb[2].mxu0 }
 0x1db   : > { %v5834_v15 = vadd.f32 %v5772_v57, %v5522_v4  ;;  %v4309_v30 = vpop.f32.mrb[3].mxu0 }
 0x1dc   : > { %v5840_v55 = vadd.f32 %v4309_v30, %v1924_v47 }
 0x1dd   : > { %4493 = vst [vmem:[%s7855_s4 + $0x18] sm:$0xff] %v5834_v15 }
 0x1de   : > { %4492 = vst [vmem:[%s7855_s4 + $0x10] sm:$0xff] %v5840_v55  ;;  %v5775_v49 = vpop.f32.mrb[4].mxu0 }
 0x1df   : > { %v5846_v6 = vadd.f32 %v5775_v49, %v5525_v7  ;;  %v4319_v22 = vpop.f32.mrb[5].mxu0 }
 0x1e0   : > { %v5852_v23 = vadd.f32 %v4319_v22, %v1934_v31 }
 0x1e1   : > { %4495 = vst [vmem:[%s7855_s4 + $0x28] sm:$0xff] %v5846_v6 }
 0x1e2   : > { %4494 = vst [vmem:[%s7855_s4 + $0x20] sm:$0xff] %v5852_v23  ;;  %v5778_v35 = vpop.f32.mrb[6].mxu0 }
 0x1e3   : > { %v5858_v21 = vadd.f32 %v5778_v35, %v5528_v1  ;;  %v4329_v62 = vpop.f32.mrb[7].mxu0 }
 0x1e4   : > { %v5864_v44 = vadd.f32 %v4329_v62, %v1944_v5 }
 0x1e5   : > { %4497 = vst [vmem:[%s7855_s4 + $0x38] sm:$0xff] %v5858_v21 }
 0x1e6   : > { %4496 = vst [vmem:[%s7855_s4 + $0x30] sm:$0xff] %v5864_v44  ;;  %v5781_v32 = vpop.f32.mrb[8].mxu0 }
 0x1e7   : > { %v5870_v11 = vadd.f32 %v5781_v32, %v5531_v56  ;;  %v4339_v12 = vpop.f32.mrb[9].mxu0 }
 0x1e8   : > { %v5876_v17 = vadd.f32 %v4339_v12, %v1954_v28 }
 0x1e9   : > { %4499 = vst [vmem:[%s7855_s4 + $0x48] sm:$0xff] %v5870_v11 }
 0x1ea   : > { %4498 = vst [vmem:[%s7855_s4 + $0x40] sm:$0xff] %v5876_v17  ;;  %v5784_v52 = vpop.f32.mrb[10].mxu0 }
 0x1eb   : > { %v5882_v41 = vadd.f32 %v5784_v52, %v5534_v60  ;;  %v4349_v51 = vpop.f32.mrb[11].mxu0 }
 0x1ec   : > { %v5888_v33 = vadd.f32 %v4349_v51, %v1964_v14 }
 0x1ed   : > { %4501 = vst [vmem:[%s7855_s4 + $0x58] sm:$0xff] %v5882_v41 }
 0x1ee   : > { %4500 = vst [vmem:[%s7855_s4 + $0x50] sm:$0xff] %v5888_v33  ;;  %v5787_v34 = vpop.f32.mrb[12].mxu0 }
 0x1ef   : > { %v5894_v48 = vadd.f32 %v5787_v34, %v5537_v58  ;;  %v4359_v42 = vpop.f32.mrb[13].mxu0 }
 0x1f0   : > { %v5900_v29 = vadd.f32 %v4359_v42, %v1974_v16 }
 0x1f1   : > { %4503 = vst [vmem:[%s7855_s4 + $0x68] sm:$0xff] %v5894_v48 }
 0x1f2   : > { %4502 = vst [vmem:[%s7855_s4 + $0x60] sm:$0xff] %v5900_v29  ;;  %v5790_v63 = vpop.f32.mrb[14].mxu0  ;;  %v5593_v10 = vpop.f32.mrb[16].mxu1 }
 0x1f3   : > { %v5906_v61 = vadd.f32 %v5790_v63, %v5540_v38  ;;  %v4369_v36 = vpop.f32.mrb[15].mxu0  ;;  %v2480_v24 = vpop.f32.mrb[17].mxu1 }
 0x1f4   : > { %v5912_v59 = vadd.f32 %v4369_v36, %v1984_v27 }
 0x1f5   : > { %4505 = vst [vmem:[%s7855_s4 + $0x78] sm:$0xff] %v5906_v61 }
 0x1f6   : > { %4504 = vst [vmem:[%s7855_s4 + $0x70] sm:$0xff] %v5912_v59  ;;  %v5793_v43 = vpop.f32.mrb[16].mxu0  ;;  %v5596_v46 = vpop.f32.mrb[18].mxu1 }
 0x1f7   : > { %v5918_v26 = vadd.f32 %v5793_v43, %v5593_v10  ;;  %v4379_v53 = vpop.f32.mrb[17].mxu0  ;;  %v2490_v18 = vpop.f32.mrb[19].mxu1 }
 0x1f8   : > { %v5924_v37 = vadd.f32 %v4379_v53, %v2480_v24 }
 0x1f9   : > { %4507 = vst [vmem:[%s7855_s4 + $0x88] sm:$0xff] %v5918_v26 }
 0x1fa   : > { %4506 = vst [vmem:[%s7855_s4 + $0x80] sm:$0xff] %v5924_v37  ;;  %v5796_v0 = vpop.f32.mrb[18].mxu0  ;;  %v5599_v9 = vpop.f32.mrb[20].mxu1 }
 0x1fb   : > { %v5930_v20 = vadd.f32 %v5796_v0, %v5596_v46  ;;  %v4389_v13 = vpop.f32.mrb[19].mxu0  ;;  %v2500_v45 = vpop.f32.mrb[21].mxu1 }
 0x1fc   : > { %v5936_v2 = vadd.f32 %v4389_v13, %v2490_v18 }
 0x1fd   : > { %4509 = vst [vmem:[%s7855_s4 + $0x98] sm:$0xff] %v5930_v20 }
 0x1fe   : > { %4508 = vst [vmem:[%s7855_s4 + $0x90] sm:$0xff] %v5936_v2  ;;  %v5799_v3 = vpop.f32.mrb[20].mxu0  ;;  %v5602_v8 = vpop.f32.mrb[22].mxu1 }
 0x1ff   : > { %v5942_v50 = vadd.f32 %v5799_v3, %v5599_v9  ;;  %v4399_v40 = vpop.f32.mrb[21].mxu0  ;;  %v2510_v4 = vpop.f32.mrb[23].mxu1 }
 0x200   : > { %v5948_v47 = vadd.f32 %v4399_v40, %v2500_v45 }
 0x201   : > { %4511 = vst [vmem:[%s7855_s4 + $0xa8] sm:$0xff] %v5942_v50 }
 0x202   : > { %4510 = vst [vmem:[%s7855_s4 + $0xa0] sm:$0xff] %v5948_v47  ;;  %v5802_v7 = vpop.f32.mrb[22].mxu0  ;;  %v5605_v31 = vpop.f32.mrb[24].mxu1 }
 0x203   : > { %v5954_v1 = vadd.f32 %v5802_v7, %v5602_v8  ;;  %v4409_v5 = vpop.f32.mrb[23].mxu0  ;;  %v2520_v56 = vpop.f32.mrb[25].mxu1 }
 0x204   : > { %v5960_v28 = vadd.f32 %v4409_v5, %v2510_v4 }
 0x205   : > { %4513 = vst [vmem:[%s7855_s4 + $0xb8] sm:$0xff] %v5954_v1 }
 0x206   : > { %4512 = vst [vmem:[%s7855_s4 + $0xb0] sm:$0xff] %v5960_v28  ;;  %v5805_v60 = vpop.f32.mrb[24].mxu0  ;;  %v5608_v14 = vpop.f32.mrb[26].mxu1 }
 0x207   : > { %v5966_v58 = vadd.f32 %v5805_v60, %v5605_v31  ;;  %v4419_v16 = vpop.f32.mrb[25].mxu0  ;;  %v2530_v38 = vpop.f32.mrb[27].mxu1 }
 0x208   : > { %v5972_v27 = vadd.f32 %v4419_v16, %v2520_v56 }
 0x209   : > { %4515 = vst [vmem:[%s7855_s4 + $0xc8] sm:$0xff] %v5966_v58 }
 0x20a   : > { %4514 = vst [vmem:[%s7855_s4 + $0xc0] sm:$0xff] %v5972_v27  ;;  %v5808_v25 = vpop.f32.mrb[26].mxu0  ;;  %v5611_v39 = vpop.f32.mrb[28].mxu1 }
 0x20b   : > { %v5978_v19 = vadd.f32 %v5808_v25, %v5608_v14  ;;  %v4429_v54 = vpop.f32.mrb[27].mxu0  ;;  %v2540_v57 = vpop.f32.mrb[29].mxu1 }
 0x20c   : > { %v5984_v15 = vadd.f32 %v4429_v54, %v2530_v38 }
 0x20d   : > { %4517 = vst [vmem:[%s7855_s4 + $0xd8] sm:$0xff] %v5978_v19 }
 0x20e   : > { %4516 = vst [vmem:[%s7855_s4 + $0xd0] sm:$0xff] %v5984_v15  ;;  %v5811_v30 = vpop.f32.mrb[28].mxu0  ;;  %v5614_v55 = vpop.f32.mrb[30].mxu1 }
 0x20f   : > { %v5990_v49 = vadd.f32 %v5811_v30, %v5611_v39  ;;  %v4439_v6 = vpop.f32.mrb[29].mxu0  ;;  %v2550_v22 = vpop.f32.mrb[31].mxu1 }
 0x210   : > { %v5996_v23 = vadd.f32 %v4439_v6, %v2540_v57 }
 0x211   : > { %4519 = vst [vmem:[%s7855_s4 + $0xe8] sm:$0xff] %v5990_v49 }
 0x212   : > { %4518 = vst [vmem:[%s7855_s4 + $0xe0] sm:$0xff] %v5996_v23  ;;  %v5814_v35 = vpop.f32.mrb[30].mxu0 }
 0x213   : > { %v6002_v21 = vadd.f32 %v5814_v35, %v5614_v55  ;;  %v4449_v62 = vpop.f32.mrb[31].mxu0 }
 0x214   : > { %v6008_v44 = vadd.f32 %v4449_v62, %v2550_v22 }
 0x215   : > { %4521 = vst [vmem:[%s7855_s4 + $0xf8] sm:$0xff] %v6002_v21 }
 0x216   : > { %4520 = vst [vmem:[%s7855_s4 + $0xf0] sm:$0xff] %v6008_v44 }
 0x217   : > { %6329 = shalt.err (!%p6326_p5)
}
 0x218   : > { %s6330_s24 = scalar_lea.hbm %s7892_s15, 4096  ;;  %s6334_s27 = scalar_lea.hbm %s7948_s2, 8192 }
 0x219   : > { %p6331_p6 = scmp.ne.s32.totalorder %s7892_s15, %s6330_s24  ;;  %p6335_p10 = scmp.lt.u32.totalorder %s7892_s15, %s7948_s2 }
 0x21a   : > { %p6336_p11 = scmp.lt.u32.totalorder %s6334_s27, %s6330_s24  ;;  %p6338_p13 = scmp.lt.u32.totalorder %s6330_s24, %s7892_s15 }
 0x21b   : > { %p6332_p7 = pnand %p6331_p6, %p6454_p4 }
 0x21c   : > { %p6337_p12 = por %p6336_p11, %p6335_p10 }
 0x21d   : > { %p6333_p9 = pneg %p6332_p7 }
 0x21e   : > { %p6339_p0 = por %p6338_p13, %p6337_p12 }
 0x220   : > { %p6340_p1 = pnand %p6339_p0, %p6333_p9 }
 0x222   : > { %6343 = shalt.err (!%p6340_p1)
}
 0x223   : > { %s6397_s30 = smov 128   ;;  %s6398_s3 = smov 8  }
 0x224   : > { %6234 = dma.vmem_to_hbm [thread:$0]  (%p6454_p4), %s7894_s6, 4096, %s7892_s15, %s7900_s12, %s6397_s30, %s6397_s30, %s6398_s3  }
 0x225 PF: > { %p6240_p2 = scmp.ge.s32.totalorder %s6394_s14, 2  ;;  %s4556_s4 = sand.u32 1, %s6374_s9  }
 0x226   : > { %s4557_s5 = scalar_lea.sflag [#allocation3], %s4556_s4 }
 0x227   : > { %p6237_p3 = pnand %p6240_p2, %p6461_p8 }
 0x229   : > { %6369 = dma.done.wait (!%p6237_p3), %s4557_s5, 4096  }
 0x22a   : > { %6371 = vsyncadd (!%p6237_p3), %s4557_s5, 4294963200  ;;  %s15_s14 = sadd.s32 1, %s6394_s14   ;;  %s8156_s9 = smov %s6378_s10 }
 0x22b   : > { %p12_p5 = scmp.ge.s32.totalorder %s15_s14, 4   ;;  %s8157_s10 = smov %s6382_s11 }
 0x22c   : > { %s8158_s11 = smov %s6467_s22  ;;  %s8159_s12 = smov %s6390_s13 }
 0x22d   : > { %s8160_s13 = smov %s8162_s17  ;;  %14 = sbr.rel (!%p12_p5) target bundleno = 4 (0x4), region = 77 }
 0x234   :  { %4562 = vsyncpa [#allocation3], 1 }
 0x235   :  { %4564 = vsyncpa [#allocation3 + $0x1], 1 }

</bundles_post_ra>
